<compile_context>
chip_gen: v5e
topology: v5e:2x2
jax: 0.10.0
libtpu: 0.0.40
codegen_flags: <defaults>
</compile_context>

<pallas_src>
import functools
import math

import jax
import jax.numpy as jnp
import numpy as np
from jax import lax
from jax.experimental import pallas as pl
from jax.experimental.pallas import tpu as pltpu


# ----------------------------- Pallas kernel ------------------------------ #

def _layer_norm_fm(x, gamma_col, beta_col, eps=1e-5):
    """Feature-major LayerNorm: x is [C, M], normalize over channels (axis 0)."""
    mu = jnp.mean(x, axis=0, keepdims=True)
    var = jnp.mean(jnp.square(x - mu), axis=0, keepdims=True)
    return (x - mu) * lax.rsqrt(var + eps) * gamma_col + beta_col


def _gelu_exact(x):
    # nn.GELU() default = exact erf formulation
    return 0.5 * x * (1.0 + lax.erf(x / jnp.sqrt(jnp.float32(2.0))))


def self_attention_kernel(
    x_ref,        # [C, N]     one batch, feature-major (channels x tokens)
    wqkv_ref,     # [3C, C]    fused QKV weight, PyTorch [out,in] layout (q rows pre-scaled)
    bqkv_ref,     # [3C, 1]    fused QKV bias as a column (q part pre-scaled)
    mats_ref,     # [3, C, C]  stacked native-layout weights: wo, w1, w2
    vecs_ref,     # [C, 7]     columns: g1, b1, bo, g2, b2, fb1, fb2
    mask_ref,     # [C, H*N]   head block mask (f32, precomputed on host)
    o_ref,        # [C, N]
    *, n_heads, n_tokens,
):
    f32 = jnp.float32
    x = x_ref[...].astype(f32)                 # [C, N]
    C = x.shape[0]
    N = n_tokens

    vecs = vecs_ref[...]                       # [C, 7]
    g1, b1 = vecs[:, 0:1], vecs[:, 1:2]
    bo = vecs[:, 2:3]
    g2, b2 = vecs[:, 3:4], vecs[:, 4:5]
    fb1, fb2 = vecs[:, 5:6], vecs[:, 6:7]

    # ---- LayerNorm (self.ln), feature-major ----
    x_ln = _layer_norm_fm(x, g1, b1)

    # ---- fused QKV projection: one [3C,C]x[C,N] MXU push ----
    qkv = jnp.dot(wqkv_ref[...], x_ln, preferred_element_type=f32) + bqkv_ref[...]  # [3C, N]
    q = qkv[0:C, :]            # [C, N]  (softmax scale already folded in)
    k = qkv[C:2 * C, :]        # [C, N]
    v = qkv[2 * C:3 * C, :]    # [C, N]

    # ---- block-diagonal (per-head) K and V on the lane axis ----
    mask = mask_ref[...]                                 # [C, H*N]
    k_bd = jnp.tile(k, (1, n_heads)) * mask              # [C, H*N]
    v_bd = jnp.tile(v, (1, n_heads)) * mask              # [C, H*N]

    # ---- scores for ALL heads in one push: [N,C] x [C,H*N] ----
    s = jnp.dot(q.T, k_bd, preferred_element_type=f32)   # [N, H*N]

    # ---- softmax over each head's key block (row-wide max is exact here:
    #      the per-row shift cancels in the per-head normalization) ----
    s = s - jnp.max(s, axis=-1, keepdims=True)
    p = jnp.exp(s)                                        # [N, H*N]

    # ---- P@V and the per-head denominators as two K=256 matmuls ----
    dims = (((1,), (1,)), ((), ()))                       # contract last dims (rhs transposed)
    o_heads = lax.dot_general(v_bd, p, dims, preferred_element_type=f32)   # [C, N]
    denom = lax.dot_general(mask, p, dims, preferred_element_type=f32)     # [C, N]
    attn_heads = o_heads * pl.reciprocal(denom, approx=True)               # [C, N]

    # ---- single output projection + bias, then first residual ----
    attn = jnp.dot(mats_ref[0], attn_heads, preferred_element_type=f32) + bo
    h1 = attn + x                                         # [C, N]

    # ---- ff_self: LayerNorm -> Linear -> GELU -> Linear, plus residual ----
    h1_ln = _layer_norm_fm(h1, g2, b2)
    ff = jnp.dot(mats_ref[1], h1_ln, preferred_element_type=f32) + fb1
    ff = _gelu_exact(ff)
    ff = jnp.dot(mats_ref[2], ff, preferred_element_type=f32) + fb2

    o_ref[...] = (ff + h1).astype(o_ref.dtype)


# ------------------------------- wrapper ----------------------------------- #

def self_attention_pallas(x_nchw, params, *, n_heads=4):
    """x_nchw: [B, C, size, size] -> [B, C, size, size]."""
    B, C, H, W = x_nchw.shape
    N = H * W
    assert C % n_heads == 0
    D = C // n_heads
    HN = n_heads * N
    scale = jnp.float32(1.0 / math.sqrt(D))

    # Free view: NCHW -> [B, C, N].  No host-side transposes of activations.
    x = x_nchw.reshape(B, C, N).astype(jnp.float32)

    # Parameter packing (native PyTorch [out,in] layout, no .T anywhere).
    w_qkv = jnp.concatenate(
        [params["wq"] * scale, params["wk"], params["wv"]], axis=0)          # [3C, C]
    b_qkv = jnp.concatenate(
        [params["bq"] * scale, params["bk"], params["bv"]], axis=1).T        # [3C, 1]
    mats = jnp.stack([params["wo"], params["w1"], params["w2"]], axis=0)     # [3, C, C]
    vecs = jnp.concatenate(
        [params["g1"], params["b1"], params["bo"], params["g2"],
         params["b2"], params["fb1"], params["fb2"]], axis=0).T              # [C, 7]

    # Head block mask [C, H*N]: channel c contributes only to its head's key block.
    row_head = (jnp.arange(C, dtype=jnp.int32) // D)[:, None]
    col_head = (jnp.arange(HN, dtype=jnp.int32) // N)[None, :]
    mask = (row_head == col_head).astype(jnp.float32)                        # [C, H*N]

    out = pl.pallas_call(
        functools.partial(self_attention_kernel, n_heads=n_heads, n_tokens=N),
        out_shape=jax.ShapeDtypeStruct((B, C, N), jnp.float32),
        grid_spec=pltpu.PrefetchScalarGridSpec(
            num_scalar_prefetch=0,
            grid=(B,),                                     # one batch per step; 2 TCs on v7x
            in_specs=[
                pl.BlockSpec((None, C, N), lambda b: (b, 0, 0)),   # x, per-batch [C, N]
                pl.BlockSpec((3 * C, C), lambda b: (0, 0)),        # w_qkv
                pl.BlockSpec((3 * C, 1), lambda b: (0, 0)),        # b_qkv
                pl.BlockSpec((3, C, C), lambda b: (0, 0, 0)),      # mats
                pl.BlockSpec((C, 7), lambda b: (0, 0)),            # vecs
                pl.BlockSpec((C, HN), lambda b: (0, 0)),           # head mask
            ],
            out_specs=pl.BlockSpec((None, C, N), lambda b: (b, 0, 0)),
        ),
        compiler_params=pltpu.CompilerParams(
            dimension_semantics=("parallel",)),
    )(x, w_qkv, b_qkv, mats, vecs, mask)

    # Free view back: [B, C, N] -> NCHW.
    return out.reshape(B, C, H, W)


# ------------------------- pure-JAX reference ------------------------------ #

def self_attention_ref(x_nchw, p, *, n_heads=4):
    B, C, H, W = x_nchw.shape
    N = H * W
    D = C // n_heads
    x = x_nchw.reshape(B, C, N).transpose(0, 2, 1).astype(jnp.float32)

    def ln(v, g, b):
        m = jnp.mean(v, axis=-1, keepdims=True)
        var = jnp.mean(jnp.square(v - m), axis=-1, keepdims=True)
        return (v - m) * lax.rsqrt(var + 1e-5) * g + b

    x_ln = ln(x, p["g1"], p["b1"])
    q = x_ln @ p["wq"].T + p["bq"]
    k = x_ln @ p["wk"].T + p["bk"]
    v = x_ln @ p["wv"].T + p["bv"]
    qh = q.reshape(B, N, n_heads, D).transpose(0, 2, 1, 3) / math.sqrt(D)
    kh = k.reshape(B, N, n_heads, D).transpose(0, 2, 1, 3)
    vh = v.reshape(B, N, n_heads, D).transpose(0, 2, 1, 3)
    s = jnp.einsum("bhnd,bhmd->bhnm", qh, kh)
    pw = jax.nn.softmax(s, axis=-1)
    o = jnp.einsum("bhnm,bhmd->bhnd", pw, vh).transpose(0, 2, 1, 3).reshape(B, N, C)
    attn = o @ p["wo"].T + p["bo"]
    h1 = attn + x
    ff = ln(h1, p["g2"], p["b2"]) @ p["w1"].T + p["fb1"]
    ff = jax.nn.gelu(ff, approximate=False)
    ff = ff @ p["w2"].T + p["fb2"]
    out = ff + h1
    return out.transpose(0, 2, 1).reshape(B, C, H, W)


# --------------------------------- main ------------------------------------ #

if __name__ == "__main__":
    B, C, SIZE, HEADS = 2, 32, 8, 4          # channels divisible by 4 heads
    key = jax.random.PRNGKey(0)
    keys = jax.random.split(key, 16)

    def mat(k):
        return jax.random.normal(k, (C, C), jnp.float32) * 0.05

    def vec(k, scale=0.02):
        return jax.random.normal(k, (1, C), jnp.float32) * scale

    params = {
        "g1": jnp.ones((1, C), jnp.float32),  "b1": jnp.zeros((1, C), jnp.float32),
        "wq": mat(keys[0]), "bq": vec(keys[1]),
        "wk": mat(keys[2]), "bk": vec(keys[3]),
        "wv": mat(keys[4]), "bv": vec(keys[5]),
        "wo": mat(keys[6]), "bo": vec(keys[7]),
        "g2": jnp.ones((1, C), jnp.float32),  "b2": jnp.zeros((1, C), jnp.float32),
        "w1": mat(keys[8]), "fb1": vec(keys[9]),
        "w2": mat(keys[10]), "fb2": vec(keys[11]),
    }

    x = jax.random.normal(keys[12], (B, C, SIZE, SIZE), jnp.float32)

    y = self_attention_pallas(x, params, n_heads=HEADS)
    y = jax.block_until_ready(y)

    y_ref = jax.block_until_ready(self_attention_ref(x, params, n_heads=HEADS))
    # Slightly relaxed vs 1e-3 because softmax uses pl.reciprocal(approx=True) (EUP).
    np.testing.assert_allclose(np.asarray(y), np.asarray(y_ref), rtol=2e-3, atol=2e-3)

    print("KERNEL_OK")
</pallas_src>

<mosaic_0001>
module attributes {stable_mosaic.version = 11 : i64} {
  func.func @self_attention_kernel(%arg0: i32, %arg1: memref<1x32x64xf32, #tpu.memory_space<vmem>>, %arg2: memref<96x32xf32, #tpu.memory_space<vmem>>, %arg3: memref<96x1xf32, #tpu.memory_space<vmem>>, %arg4: memref<3x32x32xf32, #tpu.memory_space<vmem>>, %arg5: memref<32x7xf32, #tpu.memory_space<vmem>>, %arg6: memref<32x256xf32, #tpu.memory_space<vmem>>, %arg7: memref<1x32x64xf32, #tpu.memory_space<vmem>>) attributes {dimension_semantics = [#tpu.dimension_semantics<parallel>], iteration_bounds = array<i64: 2>, scalar_prefetch = 0 : i64, scratch_operands = 0 : i64, tpu.core_type = #tpu.core_type<tc>, window_params = [{transform_indices = @transform_0, window_bounds = array<i64: 1, 32, 64>}, {pipeline_mode = #tpu.pipeline_mode<synchronous>, transform_indices = @transform_1, window_bounds = array<i64: 96, 32>}, {pipeline_mode = #tpu.pipeline_mode<synchronous>, transform_indices = @transform_2, window_bounds = array<i64: 96, 1>}, {pipeline_mode = #tpu.pipeline_mode<synchronous>, transform_indices = @transform_3, window_bounds = array<i64: 3, 32, 32>}, {pipeline_mode = #tpu.pipeline_mode<synchronous>, transform_indices = @transform_4, window_bounds = array<i64: 32, 7>}, {pipeline_mode = #tpu.pipeline_mode<synchronous>, transform_indices = @transform_5, window_bounds = array<i64: 32, 256>}, {transform_indices = @transform_6, window_bounds = array<i64: 1, 32, 64>}]} {
    %c0 = arith.constant 0 : index
    %c0_0 = arith.constant 0 : index
    %c0_1 = arith.constant 0 : index
    %0 = vector.load %arg1[%c0, %c0_0, %c0_1] : memref<1x32x64xf32, #tpu.memory_space<vmem>>, vector<1x32x64xf32>
    %1 = vector.shape_cast %0 : vector<1x32x64xf32> to vector<32x64xf32>
    %c0_2 = arith.constant 0 : index
    %c0_3 = arith.constant 0 : index
    %2 = vector.load %arg5[%c0_2, %c0_3] : memref<32x7xf32, #tpu.memory_space<vmem>>, vector<32x7xf32>
    %3 = vector.extract_strided_slice %2 {offsets = [0, 0], sizes = [32, 1], strides = [1, 1]} : vector<32x7xf32> to vector<32x1xf32>
    %4 = vector.extract_strided_slice %2 {offsets = [0, 1], sizes = [32, 1], strides = [1, 1]} : vector<32x7xf32> to vector<32x1xf32>
    %5 = vector.extract_strided_slice %2 {offsets = [0, 2], sizes = [32, 1], strides = [1, 1]} : vector<32x7xf32> to vector<32x1xf32>
    %6 = vector.extract_strided_slice %2 {offsets = [0, 3], sizes = [32, 1], strides = [1, 1]} : vector<32x7xf32> to vector<32x1xf32>
    %7 = vector.extract_strided_slice %2 {offsets = [0, 4], sizes = [32, 1], strides = [1, 1]} : vector<32x7xf32> to vector<32x1xf32>
    %8 = vector.extract_strided_slice %2 {offsets = [0, 5], sizes = [32, 1], strides = [1, 1]} : vector<32x7xf32> to vector<32x1xf32>
    %9 = vector.extract_strided_slice %2 {offsets = [0, 6], sizes = [32, 1], strides = [1, 1]} : vector<32x7xf32> to vector<32x1xf32>
    %cst = arith.constant dense<0.000000e+00> : vector<64xf32>
    %10 = vector.multi_reduction <add>, %1, %cst [0] : vector<32x64xf32> to vector<64xf32>
    %11 = vector.shape_cast %10 : vector<64xf32> to vector<1x64xf32>
    %cst_4 = arith.constant 3.200000e+01 : f32
    %12 = vector.broadcast %cst_4 : f32 to vector<1x64xf32>
    %13 = arith.divf %11, %12 : vector<1x64xf32>
    %14 = vector.broadcast %13 : vector<1x64xf32> to vector<32x64xf32>
    %15 = arith.subf %1, %14 : vector<32x64xf32>
    %16 = arith.mulf %15, %15 : vector<32x64xf32>
    %cst_5 = arith.constant dense<0.000000e+00> : vector<64xf32>
    %17 = vector.multi_reduction <add>, %16, %cst_5 [0] : vector<32x64xf32> to vector<64xf32>
    %18 = vector.shape_cast %17 : vector<64xf32> to vector<1x64xf32>
    %cst_6 = arith.constant 3.200000e+01 : f32
    %19 = vector.broadcast %cst_6 : f32 to vector<1x64xf32>
    %20 = arith.divf %18, %19 : vector<1x64xf32>
    %21 = vector.broadcast %13 : vector<1x64xf32> to vector<32x64xf32>
    %22 = arith.subf %1, %21 : vector<32x64xf32>
    %cst_7 = arith.constant 9.99999974E-6 : f32
    %23 = vector.broadcast %cst_7 : f32 to vector<1x64xf32>
    %24 = arith.addf %20, %23 : vector<1x64xf32>
    %25 = math.rsqrt %24 : vector<1x64xf32>
    %26 = vector.broadcast %25 : vector<1x64xf32> to vector<32x64xf32>
    %27 = arith.mulf %22, %26 : vector<32x64xf32>
    %28 = vector.broadcast %3 : vector<32x1xf32> to vector<32x64xf32>
    %29 = arith.mulf %27, %28 : vector<32x64xf32>
    %30 = vector.broadcast %4 : vector<32x1xf32> to vector<32x64xf32>
    %31 = arith.addf %29, %30 : vector<32x64xf32>
    %c0_8 = arith.constant 0 : index
    %c0_9 = arith.constant 0 : index
    %32 = vector.load %arg2[%c0_8, %c0_9] : memref<96x32xf32, #tpu.memory_space<vmem>>, vector<96x32xf32>
    %cst_10 = arith.constant dense<0.000000e+00> : vector<96x64xf32>
    %33 = tpu.matmul %32, %31, %cst_10 {dimension_numbers = #tpu.dot_dimension_numbers<[1], [0], [0], [1], [0, 0, 1, 1], [], []>} : vector<96x32xf32>, vector<32x64xf32>, vector<96x64xf32> -> vector<96x64xf32>
    %c0_11 = arith.constant 0 : index
    %c0_12 = arith.constant 0 : index
    %34 = vector.load %arg3[%c0_11, %c0_12] : memref<96x1xf32, #tpu.memory_space<vmem>>, vector<96x1xf32>
    %35 = vector.broadcast %34 : vector<96x1xf32> to vector<96x64xf32>
    %36 = arith.addf %33, %35 : vector<96x64xf32>
    %37 = vector.extract_strided_slice %36 {offsets = [0, 0], sizes = [32, 64], strides = [1, 1]} : vector<96x64xf32> to vector<32x64xf32>
    %38 = vector.extract_strided_slice %36 {offsets = [32, 0], sizes = [32, 64], strides = [1, 1]} : vector<96x64xf32> to vector<32x64xf32>
    %39 = vector.extract_strided_slice %36 {offsets = [64, 0], sizes = [32, 64], strides = [1, 1]} : vector<96x64xf32> to vector<32x64xf32>
    %c0_13 = arith.constant 0 : index
    %c0_14 = arith.constant 0 : index
    %40 = vector.load %arg6[%c0_13, %c0_14] : memref<32x256xf32, #tpu.memory_space<vmem>>, vector<32x256xf32>
    %41 = tpu.concatenate %38, %38, %38, %38 in 1 : vector<32x64xf32>, vector<32x64xf32>, vector<32x64xf32>, vector<32x64xf32> -> vector<32x256xf32>
    %42 = arith.mulf %41, %40 : vector<32x256xf32>
    %43 = tpu.concatenate %39, %39, %39, %39 in 1 : vector<32x64xf32>, vector<32x64xf32>, vector<32x64xf32>, vector<32x64xf32> -> vector<32x256xf32>
    %44 = arith.mulf %43, %40 : vector<32x256xf32>
    %45 = tpu.transpose %37, [1, 0] : vector<32x64xf32> -> vector<64x32xf32>
    %cst_15 = arith.constant dense<0.000000e+00> : vector<64x256xf32>
    %46 = tpu.matmul %45, %42, %cst_15 {dimension_numbers = #tpu.dot_dimension_numbers<[1], [0], [0], [1], [0, 0, 1, 1], [], []>} : vector<64x32xf32>, vector<32x256xf32>, vector<64x256xf32> -> vector<64x256xf32>
    %cst_16 = arith.constant dense<0xFF800000> : vector<64xf32>
    %47 = vector.multi_reduction <maximumf>, %46, %cst_16 [1] : vector<64x256xf32> to vector<64xf32>
    %48 = vector.shape_cast %47 : vector<64xf32> to vector<64x1xf32>
    %49 = vector.broadcast %48 : vector<64x1xf32> to vector<64x256xf32>
    %50 = arith.subf %46, %49 : vector<64x256xf32>
    %51 = math.exp %50 : vector<64x256xf32>
    %cst_17 = arith.constant dense<0.000000e+00> : vector<32x64xf32>
    %52 = tpu.matmul %44, %51, %cst_17 {dimension_numbers = #tpu.dot_dimension_numbers<[1], [1], [0], [0], [0, 0, 1, 0], [], []>} : vector<32x256xf32>, vector<64x256xf32>, vector<32x64xf32> -> vector<32x64xf32>
    %cst_18 = arith.constant dense<0.000000e+00> : vector<32x64xf32>
    %53 = tpu.matmul %40, %51, %cst_18 {dimension_numbers = #tpu.dot_dimension_numbers<[1], [1], [0], [0], [0, 0, 1, 0], [], []>} : vector<32x256xf32>, vector<64x256xf32>, vector<32x64xf32> -> vector<32x64xf32>
    %54 = tpu.reciprocal %53 {approx = true} : vector<32x64xf32> -> vector<32x64xf32>
    %55 = arith.mulf %52, %54 : vector<32x64xf32>
    %c0_19 = arith.constant 0 : index
    %c0_20 = arith.constant 0 : index
    %c0_21 = arith.constant 0 : index
    %56 = vector.load %arg4[%c0_19, %c0_20, %c0_21] : memref<3x32x32xf32, #tpu.memory_space<vmem>>, vector<1x32x32xf32>
    %57 = vector.shape_cast %56 : vector<1x32x32xf32> to vector<32x32xf32>
    %cst_22 = arith.constant dense<0.000000e+00> : vector<32x64xf32>
    %58 = tpu.matmul %57, %55, %cst_22 {dimension_numbers = #tpu.dot_dimension_numbers<[1], [0], [0], [1], [0, 0, 1, 1], [], []>} : vector<32x32xf32>, vector<32x64xf32>, vector<32x64xf32> -> vector<32x64xf32>
    %59 = vector.broadcast %5 : vector<32x1xf32> to vector<32x64xf32>
    %60 = arith.addf %58, %59 : vector<32x64xf32>
    %61 = arith.addf %60, %1 : vector<32x64xf32>
    %cst_23 = arith.constant dense<0.000000e+00> : vector<64xf32>
    %62 = vector.multi_reduction <add>, %61, %cst_23 [0] : vector<32x64xf32> to vector<64xf32>
    %63 = vector.shape_cast %62 : vector<64xf32> to vector<1x64xf32>
    %cst_24 = arith.constant 3.200000e+01 : f32
    %64 = vector.broadcast %cst_24 : f32 to vector<1x64xf32>
    %65 = arith.divf %63, %64 : vector<1x64xf32>
    %66 = vector.broadcast %65 : vector<1x64xf32> to vector<32x64xf32>
    %67 = arith.subf %61, %66 : vector<32x64xf32>
    %68 = arith.mulf %67, %67 : vector<32x64xf32>
    %cst_25 = arith.constant dense<0.000000e+00> : vector<64xf32>
    %69 = vector.multi_reduction <add>, %68, %cst_25 [0] : vector<32x64xf32> to vector<64xf32>
    %70 = vector.shape_cast %69 : vector<64xf32> to vector<1x64xf32>
    %cst_26 = arith.constant 3.200000e+01 : f32
    %71 = vector.broadcast %cst_26 : f32 to vector<1x64xf32>
    %72 = arith.divf %70, %71 : vector<1x64xf32>
    %73 = vector.broadcast %65 : vector<1x64xf32> to vector<32x64xf32>
    %74 = arith.subf %61, %73 : vector<32x64xf32>
    %cst_27 = arith.constant 9.99999974E-6 : f32
    %75 = vector.broadcast %cst_27 : f32 to vector<1x64xf32>
    %76 = arith.addf %72, %75 : vector<1x64xf32>
    %77 = math.rsqrt %76 : vector<1x64xf32>
    %78 = vector.broadcast %77 : vector<1x64xf32> to vector<32x64xf32>
    %79 = arith.mulf %74, %78 : vector<32x64xf32>
    %80 = vector.broadcast %6 : vector<32x1xf32> to vector<32x64xf32>
    %81 = arith.mulf %79, %80 : vector<32x64xf32>
    %82 = vector.broadcast %7 : vector<32x1xf32> to vector<32x64xf32>
    %83 = arith.addf %81, %82 : vector<32x64xf32>
    %c1 = arith.constant 1 : index
    %c0_28 = arith.constant 0 : index
    %c0_29 = arith.constant 0 : index
    %84 = vector.load %arg4[%c1, %c0_28, %c0_29] : memref<3x32x32xf32, #tpu.memory_space<vmem>>, vector<1x32x32xf32>
    %85 = vector.shape_cast %84 : vector<1x32x32xf32> to vector<32x32xf32>
    %cst_30 = arith.constant dense<0.000000e+00> : vector<32x64xf32>
    %86 = tpu.matmul %85, %83, %cst_30 {dimension_numbers = #tpu.dot_dimension_numbers<[1], [0], [0], [1], [0, 0, 1, 1], [], []>} : vector<32x32xf32>, vector<32x64xf32>, vector<32x64xf32> -> vector<32x64xf32>
    %87 = vector.broadcast %8 : vector<32x1xf32> to vector<32x64xf32>
    %88 = arith.addf %86, %87 : vector<32x64xf32>
    %cst_31 = arith.constant 5.000000e-01 : f32
    %89 = vector.broadcast %cst_31 : f32 to vector<32x64xf32>
    %90 = arith.mulf %89, %88 : vector<32x64xf32>
    %cst_32 = arith.constant 2.000000e+00 : f32
    %91 = math.sqrt %cst_32 : f32
    %92 = vector.broadcast %91 : f32 to vector<32x64xf32>
    %93 = arith.divf %88, %92 : vector<32x64xf32>
    %94 = math.erf %93 : vector<32x64xf32>
    %cst_33 = arith.constant 1.000000e+00 : f32
    %95 = vector.broadcast %cst_33 : f32 to vector<32x64xf32>
    %96 = arith.addf %95, %94 : vector<32x64xf32>
    %97 = arith.mulf %90, %96 : vector<32x64xf32>
    %c2 = arith.constant 2 : index
    %c0_34 = arith.constant 0 : index
    %c0_35 = arith.constant 0 : index
    %98 = vector.load %arg4[%c2, %c0_34, %c0_35] : memref<3x32x32xf32, #tpu.memory_space<vmem>>, vector<1x32x32xf32>
    %99 = vector.shape_cast %98 : vector<1x32x32xf32> to vector<32x32xf32>
    %cst_36 = arith.constant dense<0.000000e+00> : vector<32x64xf32>
    %100 = tpu.matmul %99, %97, %cst_36 {dimension_numbers = #tpu.dot_dimension_numbers<[1], [0], [0], [1], [0, 0, 1, 1], [], []>} : vector<32x32xf32>, vector<32x64xf32>, vector<32x64xf32> -> vector<32x64xf32>
    %101 = vector.broadcast %9 : vector<32x1xf32> to vector<32x64xf32>
    %102 = arith.addf %100, %101 : vector<32x64xf32>
    %103 = arith.addf %102, %61 : vector<32x64xf32>
    %c0_37 = arith.constant 0 : index
    %c0_38 = arith.constant 0 : index
    %c0_39 = arith.constant 0 : index
    %104 = vector.load %arg7[%c0_37, %c0_38, %c0_39] : memref<1x32x64xf32, #tpu.memory_space<vmem>>, vector<1x32x64xf32>
    %105 = vector.shape_cast %104 : vector<1x32x64xf32> to vector<32x64xf32>
    %106 = vector.shape_cast %103 : vector<32x64xf32> to vector<1x32x64xf32>
    tpu.vector_store %arg7[%c0_37, %c0_38, %c0_39], %106 {strides = array<i32>} : memref<1x32x64xf32, #tpu.memory_space<vmem>>, vector<1x32x64xf32>,
    return
  }
  func.func @transform_0(%arg0: i32) -> (i32, i32, i32) {
    %c0_i32 = arith.constant 0 : i32
    %c0_i32_0 = arith.constant 0 : i32
    %c0_i32_1 = arith.constant 0 : i32
    return %arg0, %c0_i32, %c0_i32_0 : i32, i32, i32
  }
  func.func @transform_1(%arg0: i32) -> (i32, i32) {
    %c0_i32 = arith.constant 0 : i32
    %c0_i32_0 = arith.constant 0 : i32
    %c0_i32_1 = arith.constant 0 : i32
    return %c0_i32, %c0_i32_0 : i32, i32
  }
  func.func @transform_2(%arg0: i32) -> (i32, i32) {
    %c0_i32 = arith.constant 0 : i32
    %c0_i32_0 = arith.constant 0 : i32
    %c0_i32_1 = arith.constant 0 : i32
    return %c0_i32, %c0_i32_0 : i32, i32
  }
  func.func @transform_3(%arg0: i32) -> (i32, i32, i32) {
    %c0_i32 = arith.constant 0 : i32
    %c0_i32_0 = arith.constant 0 : i32
    %c0_i32_1 = arith.constant 0 : i32
    %c0_i32_2 = arith.constant 0 : i32
    return %c0_i32, %c0_i32_0, %c0_i32_1 : i32, i32, i32
  }
  func.func @transform_4(%arg0: i32) -> (i32, i32) {
    %c0_i32 = arith.constant 0 : i32
    %c0_i32_0 = arith.constant 0 : i32
    %c0_i32_1 = arith.constant 0 : i32
    return %c0_i32, %c0_i32_0 : i32, i32
  }
  func.func @transform_5(%arg0: i32) -> (i32, i32) {
    %c0_i32 = arith.constant 0 : i32
    %c0_i32_0 = arith.constant 0 : i32
    %c0_i32_1 = arith.constant 0 : i32
    return %c0_i32, %c0_i32_0 : i32, i32
  }
  func.func @transform_6(%arg0: i32) -> (i32, i32, i32) {
    %c0_i32 = arith.constant 0 : i32
    %c0_i32_0 = arith.constant 0 : i32
    %c0_i32_1 = arith.constant 0 : i32
    return %arg0, %c0_i32, %c0_i32_0 : i32, i32, i32
  }
}

</mosaic_0001>

<bundles_post_ra>
// kernel: tpu_custom_call.1
= control target key start
LH: loop header
LB: loop body
LE: loop exit
PB: predicated region body
PF: predicated region fallthrough
CT: control target
= control target key end

     0   :  { %11 = vsyncpa [#allocation3], 0  ;;  %s2462_s0 = inlined_call_operand.vmem [shape: f32[2,32,64], index: 0, kind: input, shape index: {}]   ;;  %s2463_s1 = inlined_call_operand.vmem [shape: f32[96,32], index: 1, kind: input, shape index: {}]   ;;  %s2464_s2 = inlined_call_operand.vmem [shape: f32[96,1], index: 2, kind: input, shape index: {}]   ;;  %s2465_s3 = inlined_call_operand.vmem [shape: f32[3,32,32], index: 3, kind: input, shape index: {}]   ;;  %s2466_s4 = inlined_call_operand.vmem [shape: f32[32,7], index: 4, kind: input, shape index: {}]   ;;  %s2467_s5 = inlined_call_operand.vmem [shape: f32[32,256], index: 5, kind: input, shape index: {}]   ;;  %s2468_s6 = inlined_call_operand.hbm [shape: f32[2,32,64], index: 6, kind: output, shape index: {}]  }
   0x1   :  { %13 = vsyncpa [#allocation3 + $0x1], 0  ;;  %s1802_s21 = smov 0   ;;  %s1804_s22 = smov 0  }
   0x2   :  { %s1806_s23 = smov 0   ;;  %s1808_s24 = smov 0  }
   0x3 LB: > { %s1823_s25 = sadd.s32 4294967295, %s1753_s24   ;;  %s1482_s26 = sadd.s32 4294967294, %s1753_s24   ;;  %s1753_s24 = sphi %s1808_s24, %s2482_s24   ;;  %s1749_s23 = sphi %s1806_s23, %s2481_s23   ;;  %s1745_s22 = sphi %s1804_s22, %s2480_s22   ;;  %s1741_s21 = sphi %s1802_s21, %s2479_s21  }
   0x4   : > { %s1827_s27 = sadd.s32 1, %s1753_s24   ;;  %s157_s28 = sadd.s32 1, %s1749_s23 }
   0x5   : > { %s154_s29 = ssub.s32 %s1753_s24, %s1827_s27  ;;  %p167_p0 = scmp.ne.s32.totalorder %s1749_s23, %s1745_s22 }
   0x6   : > { %p155_p1 = scmp.eq.s32.totalorder %s154_s29, 0  ;;  %p168_p2 = scmp.eq.s32.totalorder %s1823_s25, 1 }
   0x7   : > { %p173_p3 = scmp.ne.s32.totalorder %s1745_s22, %s1741_s21  ;;  %p174_p4 = scmp.eq.s32.totalorder %s1482_s26, 1 }
   0x8   : > { %s1838_s30 = scalar_select %p155_p1, %s1749_s23, %s157_s28  }
   0x9   : > { %p1840_p5 = por %p168_p2, %p167_p0  ;;  %p1844_p6 = por %p174_p4, %p173_p3 }
   0xa   : > { %p1485_p7 = scmp.ge.s32.totalorder %s1753_s24, 1  ;;  %p215_p8 = scmp.lt.s32.totalorder %s1753_s24, 3 }
   0xc   : > { %p216_p9 = pnand %p1485_p7, %p215_p8 }
   0xd   : > { %p245_p10 = scmp.lt.s32.totalorder (!%p216_p9), %s1823_s25, 1  ;;  %s1758_s17 = smov (!%p216_p9), 64  }
   0xe   : > { %219 = sbr.rel (%p216_p9) target bundleno = 1767 (0x6e7), region = 44  ;;  %s242_s14 = sand.u32 (!%p216_p9), 1, %s1745_s22  }
   0xf   : > { %s1486_s15 = sshll.u32 (!%p216_p9), %s242_s14, 5 }
  0x10   : > { %s244_s16 = scalar_lea.vmem (!%p216_p9), [#allocation2], %s1486_s15 }
  0x11   : > { %s1417_s28 = sshll.u32 (!%p216_p9), %s244_s16, 4  ;;  %s1418_s28 = int_to_ptr.vmem [resolvable:$true] %s1417_s28 }
  0x13   : > { %v1853_v0 = vld [vmem:[%s2466_s4 + $0x18] sm:$0xff]  ;;  %v1858_v1 = vld [vmem:[%s2466_s4 + $0x10] sm:$0xff]  ;;  %v1755_v2 = vmov 1   ;;  %v1756_v3 = vmov 0   ;;  %s246_s13 = scalar_select %p245_p10, %s1823_s25, 1  ;;  %v1868_v4 = vld [vmem:[%s2466_s4] sm:$0xff] }
  0x14   : > { %1611 = vset.pattern.permute.xlu2 %v1755_v2  ;;  %1608 = vset.pattern.permute.xlu0 %v1756_v3  ;;  %v1873_v5 = vld [vmem:[%s2466_s4 + $0x8] sm:$0xff]  ;;  %v380_v6 = vld [vmem:[%s2464_s2 + $0x38] sm:$0xff]  ;;  %vm258_vm0 = vcmask 523264   ;;  %v1757_v14 = vmov 32.0   ;;  %v373_v19 = vld [vmem:[%s2464_s2] sm:$0xff]  ;;  %vm445_vm5 = vcmask 261120  }
  0x15   : > { %1609 = vset.pattern.permute.xlu1 %v1755_v2  ;;  %334 = vperm.xlu0 %1608, %v1853_v0   ;;  %s1546_s18 = sshll.u32 %s246_s13, 5  ;;  %1631 = vrcp.f32 %v1757_v14  ;;  %v377_v28 = vld [vmem:[%s2464_s2 + $0x20] sm:$0xff]  ;;  %v376_v36 = vld [vmem:[%s2464_s2 + $0x18] sm:$0xff] }
  0x16   : > { %350 = vperm.xlu2 %1611, %v1858_v1   ;;  %354 = vperm.xlu1 %1609, %v1853_v0   ;;  %s249_s26 = scalar_lea.vmem %s2462_s0, %s1546_s18  ;;  %s1547_s18 = sshll.u32 %s1823_s25, 5 }
  0x17   : > { %v1884_v7 = vld [vmem:[%s249_s26] sm:$0xff]  ;;  %v1886_v8 = vld [vmem:[%s249_s26 + $0x8] sm:$0xff]  ;;  %v1893_v11 = vld [vmem:[%s249_s26 + $0x10] sm:$0xff]  ;;  %s1405_s25 = scalar_lea.sflag [#allocation3], %s242_s14 }
  0x18   : > { %v259_v9 = vsel %vm258_vm0, %v1884_v7, 0.0  ;;  %v260_v10 = vsel %vm258_vm0, %v1886_v8, 0.0  ;;  %v262_v13 = vsel %vm258_vm0, %v1893_v11, 0.0  ;;  %v1898_v15 = vld [vmem:[%s249_s26 + $0x18] sm:$0xff]  ;;  %s1416_s26 = scalar_lea.hbm %s2468_s6, %s1547_s18 }
  0x19   : > { %v261_v12 = vadd.f32 %v260_v10, %v259_v9  ;;  %v264_v17 = vsel %vm258_vm0, %v1898_v15, 0.0  ;;  %s1419_s29 = sshll.u32 %s1416_s26, 4  ;;  %s1420_s29 = int_to_ptr.hbm [resolvable:$true] %s1419_s29 }
  0x1a   : > { %s1705_s9 = sshra.s32 %s1420_s29, 4  ;;  %s1706_s9 = int_to_ptr.hbm [resolvable:$true] %s1705_s9 }
  0x1b   : > { %v263_v16 = vadd.f32 %v262_v13, %v261_v12  ;;  %v1632_v21 = vpop.eup %1631  ;;  %s1707_s10 = scalar_lea.hbm %s1706_s9, 32  ;;  %p1712_p0 = scmp.lt.s32.totalorder %s1706_s9, %s2468_s6 }
  0x1c   : > { %v273_v23 = vmul.f32 32.0, %v1632_v21  ;;  %vm277_vm1 = vweird.f32 %v1632_v21  ;;  %p1708_p11 = scmp.ne.s32.totalorder %s1706_s9, %s1707_s10 }
  0x1d   : > { %329 = vperm.xlu0 %1608, %v1858_v1   ;;  %v265_v18 = vadd.f32 %v264_v17, %v263_v16  ;;  %v374_v17 = vld [vmem:[%s2464_s2 + $0x8] sm:$0xff] }
  0x1e   : > { %1612 = vset.pattern.permute.xlu2 %v1756_v3  ;;  %1610 = vset.pattern.permute.xlu1 %v1756_v3  ;;  %v274_v25 = vsub.f32 1.0, %v273_v23  ;;  %p1709_p12 = pnand %p1708_p11, %p1840_p5 }
  0x1f   : > { %319 = vperm.xlu2 %1612, %v1868_v4   ;;  %324 = vperm.xlu1 %1610, %v1873_v5   ;;  %v266_v20 = vrot.slane %v265_v18, 4 }
  0x20   : > { %v275_v27 = vmul.f32 %v1632_v21, %v274_v25  ;;  %v375_v25 = vld [vmem:[%s2464_s2 + $0x10] sm:$0xff]  ;;  %p1710_p13 = pneg %p1709_p12 }
  0x21   : > { %v267_v22 = vadd.f32 %v266_v20, %v265_v18 }
  0x22   : > { %v276_v30 = vadd.f32 %v1632_v21, %v275_v27 }
  0x23   : > { %v268_v24 = vrot.slane %v267_v22, 2 }
  0x24   : > { %v1908_v32 = vsel %vm277_vm1, %v1632_v21, %v276_v30 }
  0x25   : > { %1613 = vset.pattern.permute.xlu0 %v1755_v2  ;;  %v269_v26 = vadd.f32 %v268_v24, %v267_v22 }
  0x26   : > { %346 = vperm.xlu0 %1613, %v1873_v5  }
  0x27   : > { %422 = vperm.xlu2 %1612, %v380_v6   ;;  %1614 = vset.pattern.permute.xlu1 %v1755_v2  ;;  %v270_v29 = vrot.slane %v269_v26, 1  ;;  %v379_v6 = vld [vmem:[%s2464_s2 + $0x30] sm:$0xff] }
  0x28   : > { %342 = vperm.xlu1 %1614, %v1868_v4  }
  0x29   : > { %v271_v31 = vadd.f32 %v270_v29, %v269_v26 }
  0x2b   : > { %v279_v33 = vmul.f32 %v1908_v32, %v271_v31 }
  0x2d   : > { %v280_v34 = vsub.f32 %v1884_v7, %v279_v33  ;;  %v281_v35 = vsub.f32 %v1886_v8, %v279_v33  ;;  %v282_v37 = vsub.f32 %v1893_v11, %v279_v33  ;;  %v283_v40 = vsub.f32 %v1898_v15, %v279_v33  ;;  %v361_v33 = vld [vmem:[%s2463_s1] sm:$0xff] }
  0x2e   : > { %1616 = vset.pattern.permute.xlu0 %v1756_v3 }
  0x2f   : > { %387 = vperm.xlu2 %1612, %v373_v19   ;;  %v284_v38 = vmul.f32 %v280_v34, %v280_v34  ;;  %v285_v39 = vmul.f32 %v281_v35, %v281_v35  ;;  %v286_v41 = vmul.f32 %v282_v37, %v282_v37  ;;  %v287_v45 = vmul.f32 %v283_v40, %v283_v40 }
  0x30   : > { %1615 = vset.pattern.permute.xlu1 %v1756_v3 }
  0x31   : > { %v288_v42 = vsel %vm258_vm0, %v284_v38, 0.0  ;;  %v289_v43 = vsel %vm258_vm0, %v285_v39, 0.0  ;;  %v291_v46 = vsel %vm258_vm0, %v286_v41, 0.0  ;;  %v293_v48 = vsel %vm258_vm0, %v287_v45, 0.0  ;;  %417 = vperm.xlu1 %1615, %v379_v6   ;;  %v365_v38 = vld [vmem:[%s2463_s1 + $0x20] sm:$0xff]  ;;  %v366_v39 = vld [vmem:[%s2463_s1 + $0x28] sm:$0xff] }
  0x32   : > { %v290_v44 = vadd.f32 %v289_v43, %v288_v42  ;;  %v368_v41 = vld [vmem:[%s2463_s1 + $0x38] sm:$0xff]  ;;  %v369_v42 = vld [vmem:[%s2463_s1 + $0x40] sm:$0xff]  ;;  %v370_v43 = vld [vmem:[%s2463_s1 + $0x48] sm:$0xff] }
  0x33   : > { %v384_v6 = vld [vmem:[%s2464_s2 + $0x58] sm:$0xff] }
  0x34   : > { %v292_v47 = vadd.f32 %v291_v46, %v290_v44 }
  0x36   : > { %v294_v49 = vadd.f32 %v293_v48, %v292_v47 }
  0x37   : > { %407 = vperm.xlu2 %1612, %v377_v28  }
  0x38   : > { %v295_v50 = vrot.slane %v294_v49, 4 }
  0x39   : > { %392 = vperm.xlu1 %1615, %v374_v17  }
  0x3a   : > { %v296_v51 = vadd.f32 %v295_v50, %v294_v49  ;;  %v372_v49 = vld [vmem:[%s2463_s1 + $0x58] sm:$0xff]  ;;  %v371_v50 = vld [vmem:[%s2463_s1 + $0x50] sm:$0xff] }
  0x3c   : > { %v297_v52 = vrot.slane %v296_v51, 2 }
  0x3e   : > { %v298_v53 = vadd.f32 %v297_v52, %v296_v51 }
  0x3f   : > { %402 = vperm.xlu2 %1612, %v376_v36   ;;  %v378_v36 = vld [vmem:[%s2464_s2 + $0x28] sm:$0xff] }
  0x40   : > { %v299_v54 = vrot.slane %v298_v53, 1  ;;  %412 = vperm.xlu0 %1616, %v378_v36  }
  0x41   : > { %397 = vperm.xlu1 %1615, %v375_v25  }
  0x42   : > { %v300_v55 = vadd.f32 %v299_v54, %v298_v53 }
  0x44   : > { %v301_v56 = vmul.f32 %v300_v55, %v1908_v32 }
  0x46   : > { %v302_v57 = vadd.f32 1e-05, %v301_v56 }
  0x48   : > { %1633 = vrsqrt.f32 %v302_v57  ;;  %vm309_vm2 = vweird.f32 %v302_v57 }
  0x4e   : > { %v1634_v58 = vpop.eup %1633 }
  0x4f   : > { %v304_v59 = vmul.f32 %v1634_v58, %v302_v57  ;;  %vm310_vm3 = vweird.f32 %v1634_v58  ;;  %v381_v57 = vld [vmem:[%s2464_s2 + $0x40] sm:$0xff] }
  0x50   : > { %vm311_vm4 = vmor %vm309_vm2, %vm310_vm3 }
  0x51   : > { %v305_v60 = vmul.f32 %v1634_v58, %v304_v59 }
  0x53   : > { %v306_v61 = vmul.f32 0.5, %v305_v60 }
  0x55   : > { %v307_v62 = vsub.f32 1.5, %v306_v61  ;;  %v382_v61 = vld [vmem:[%s2464_s2 + $0x48] sm:$0xff] }
  0x57   : > { %v308_v63 = vmul.f32 %v1634_v58, %v307_v62 }
  0x59   : > { %v312_v2 = vsel %vm311_vm4, %v1634_v58, %v308_v63 }
  0x5a   : > { %v316_v3 = vmul.f32 %v312_v2, %v283_v40  ;;  %v315_v16 = vmul.f32 %v312_v2, %v282_v37  ;;  %v313_v22 = vmul.f32 %v312_v2, %v280_v34  ;;  %v314_v23 = vmul.f32 %v312_v2, %v281_v35  ;;  %v362_v34 = vld [vmem:[%s2463_s1 + $0x8] sm:$0xff]  ;;  %v363_v35 = vld [vmem:[%s2463_s1 + $0x10] sm:$0xff]  ;;  %v364_v37 = vld [vmem:[%s2463_s1 + $0x18] sm:$0xff] }
  0x5b   : > { %v367_v40 = vld [vmem:[%s2463_s1 + $0x30] sm:$0xff] }
  0x70   : > { %v351_v14 = vpop.permute.xlu2 %350 }
  0x79   : > { %v320_v24 = vpop.permute.xlu2 %319 }
  0x7a   : > { %v337_v26 = vmul.f32 %v320_v24, %v313_v22  ;;  %v2009_v24 = vld [vmem:[%s2467_s5 + $0x20] sm:$0xff] }
  0x81   : > { %v423_v54 = vpop.permute.xlu2 %422 }
  0x87   : > { %v335_v9 = vpop.permute.xlu0 %334 }
  0x88   : > { %v340_v10 = vmul.f32 %v335_v9, %v316_v3  ;;  %v355_v12 = vpop.permute.xlu1 %354  ;;  %v383_v3 = vld [vmem:[%s2464_s2 + $0x50] sm:$0xff] }
  0x89   : > { %v388_v59 = vpop.permute.xlu2 %387 }
  0x8a   : > { %v360_v13 = vadd.f32 %v355_v12, %v340_v10 }
  0x8c   : > { %494 = vmatpush.msra.mxu0 %v360_v13  ;;  %1548 = vmatpush.msra.mxu2 %v360_v13 }
  0x8f   : > { %v330_v18 = vpop.permute.xlu0 %329 }
  0x90   : > { %v339_v19 = vmul.f32 %v330_v18, %v315_v16 }
  0x91   : > { %v325_v20 = vpop.permute.xlu1 %324  ;;  %v408_v63 = vpop.permute.xlu2 %407 }
  0x92   : > { %v359_v21 = vadd.f32 %v351_v14, %v339_v19  ;;  %v338_v27 = vmul.f32 %v325_v20, %v314_v23  ;;  %v2002_v19 = vld [vmem:[%s2467_s5 + $0x30] sm:$0xff] }
  0x94   : > { %495 = vmatpush.msra.mxu0 %v359_v21  ;;  %1549 = vmatpush.msra.mxu2 %v359_v21 }
  0x98   : > { %v347_v28 = vpop.permute.xlu0 %346 }
  0x99   : > { %v358_v29 = vadd.f32 %v347_v28, %v338_v27  ;;  %v403_v16 = vpop.permute.xlu2 %402  ;;  %v2016_v27 = vld [vmem:[%s2467_s5 + $0x10] sm:$0xff] }
  0x9a   : > { %v343_v30 = vpop.permute.xlu1 %342 }
  0x9b   : > { %v357_v31 = vadd.f32 %v343_v30, %v337_v26  ;;  %496 = vmatpush.msra.mxu0 %v358_v29  ;;  %1550 = vmatpush.msra.mxu2 %v358_v29  ;;  %v2023_v30 = vld [vmem:[%s2467_s5] sm:$0xff] }
  0x9d   : > { %497 = vmatpush.msra.mxu0 %v357_v31  ;;  %1551 = vmatpush.msra.mxu2 %v357_v31  ;;  %v2028_v31 = vld [vmem:[%s2467_s5 + $0x38] sm:$0xff] }
  0x9e   : > { %1489 = vmatmul.msk.f32.vlgmr.msra.gmra.mxu0 %vm445_vm5, %v361_v33  ;;  %1500 = vmatmul.msk.f32.vlgmr.msra.gmra.mxu2 %vm445_vm5, %v372_v49 }
  0xa3   : > { %v418_v55 = vpop.permute.xlu1 %417 }
  0xa6   : > { %1490 = vmatmul.msk.f32.gmra.mxu0 %vm445_vm5, %v362_v34 }
  0xab   : > { %v393_v10 = vpop.permute.xlu1 %392 }
  0xae   : > { %1491 = vmatmul.msk.f32.gmra.mxu0 %vm445_vm5, %v363_v35  ;;  %v2034_v35 = vld [vmem:[%s2467_s5 + $0x28] sm:$0xff] }
  0xb2   : > { %v413_v51 = vpop.permute.xlu0 %412 }
  0xb3   : > { %v398_v13 = vpop.permute.xlu1 %397 }
  0xb6   : > { %1492 = vmatmul.msk.f32.gmra.mxu0 %vm445_vm5, %v364_v37 }
  0xbe   : > { %1493 = vmatmul.msk.f32.gmra.mxu0 %vm445_vm5, %v365_v38  ;;  %v2041_v38 = vld [vmem:[%s2467_s5 + $0x18] sm:$0xff] }
  0xc6   : > { %1494 = vmatmul.msk.f32.gmra.mxu0 %vm445_vm5, %v366_v39 }
  0xce   : > { %1495 = vmatmul.msk.f32.gmra.mxu0 %vm445_vm5, %v367_v40  ;;  %v2047_v40 = vld [vmem:[%s2467_s5 + $0x8] sm:$0xff] }
  0xd6   : > { %1496 = vmatmul.msk.f32.gmra.mxu0 %vm445_vm5, %v368_v41 }
  0xde   : > { %1497 = vmatmul.msk.f32.gmra.mxu0 %vm445_vm5, %v369_v42 }
  0xe6   : > { %1498 = vmatmul.msk.f32.gmra.mxu0 %vm445_vm5, %v370_v43 }
  0xee   : > { %1499 = vmatmul.msk.f32.gmra.mxu0 %vm445_vm5, %v371_v50 }
 0x11b   : > { %v499_v44 = vpop.f32.mrf.mxu0 }
 0x11c   : > { %v500_v9 = vadd.f32 %v499_v44, %v388_v59 }
 0x123   : > { %v502_v45 = vpop.f32.mrf.mxu0 }
 0x124   : > { %v503_v12 = vadd.f32 %v502_v45, %v393_v10 }
 0x12b   : > { %v505_v46 = vpop.f32.mrf.mxu0 }
 0x12c   : > { %v506_v14 = vadd.f32 %v505_v46, %v398_v13 }
 0x133   : > { %v508_v47 = vpop.f32.mrf.mxu0 }
 0x134   : > { %v509_v17 = vadd.f32 %v508_v47, %v403_v16 }
 0x13b   : > { %v511_v48 = vpop.f32.mrf.mxu0 }
 0x13c   : > { %v512_v2 = vadd.f32 %v511_v48, %v408_v63 }
 0x143   : > { %v514_v52 = vpop.f32.mrf.mxu0 }
 0x144   : > { %v515_v53 = vadd.f32 %v514_v52, %v413_v51  ;;  %v532_v51 = vpop.f32.mrf.mxu2 }
 0x146   : > { %549 = vrot.lane.b32.xlu2 %v515_v53, %s1758_s17 }
 0x14b   : > { %v517_v56 = vpop.f32.mrf.mxu0 }
 0x14c   : > { %v518_v58 = vadd.f32 %v517_v56, %v418_v55 }
 0x14e   : > { %551 = vrot.lane.b32.xlu1 %v518_v58, %s1758_s17  ;;  %427 = vperm.xlu2 %1612, %v381_v57  }
 0x153   : > { %v520_v60 = vpop.f32.mrf.mxu0 }
 0x154   : > { %v521_v62 = vadd.f32 %v520_v60, %v423_v54 }
 0x156   : > { %553 = vrot.lane.b32.xlu0 %v521_v62, %s1758_s17  ;;  %432 = vperm.xlu2 %1612, %v382_v61  }
 0x15e   : > { %547 = vrot.lane.b32.xlu0 %v512_v2, %s1758_s17 }
 0x166   : > { %437 = vperm.xlu0 %1616, %v383_v3  }
 0x16e   : > { %442 = vperm.xlu0 %1616, %v384_v6  }
 0x183   : > { %599 = vxpose.xlu1.b32.start [1/4] (short) (narrow) %v500_v9, 64 }
 0x18b   : > { %600 = vxpose.xlu1.b32.cont [2/4] (short) (narrow) %v503_v12, 64 }
 0x193   : > { %601 = vxpose.xlu1.b32.cont [3/4] (short) (narrow) %v506_v14, 64 }
 0x19b   : > { %602 = vxpose.xlu1.b32.end [4/4] (short) (narrow) %v509_v17, 64 }
 0x1a0   : > { %v550_v20 = vpop.permute.xlu2 %549 }
 0x1a1   : > { %v560_v26 = vsel %vm258_vm0, %v515_v53, %v550_v20 }
 0x1a2   : > { %v565_v29 = vmul.f32 %v560_v26, %v2016_v27  ;;  %v566_v41 = vmul.f32 %v560_v26, %v2041_v38 }
 0x1c0   : > { %v552_v18 = vpop.permute.xlu1 %551 }
 0x1c1   : > { %v561_v22 = vsel %vm258_vm0, %v518_v58, %v552_v18 }
 0x1c2   : > { %v567_v28 = vmul.f32 %v561_v22, %v2009_v24  ;;  %v568_v39 = vmul.f32 %v561_v22, %v2034_v35  ;;  %v428_v22 = vpop.permute.xlu2 %427 }
 0x1c8   : > { %v554_v21 = vpop.permute.xlu0 %553 }
 0x1c9   : > { %v562_v23 = vsel %vm258_vm0, %v521_v62, %v554_v21  ;;  %v523_v21 = vpop.f32.mrf.mxu0 }
 0x1ca   : > { %v569_v25 = vmul.f32 %v562_v23, %v2002_v19  ;;  %v570_v37 = vmul.f32 %v562_v23, %v2028_v31  ;;  %v433_v26 = vpop.permute.xlu2 %432 }
 0x1cc   : > { %667 = vmatpush.msra.mxu1 %v569_v25  ;;  %1552 = vmatpush.msrb.mxu2 %v569_v25  ;;  %v2094_v25 = vadd.f32 %v523_v21, %v428_v22 }
 0x1ce   : > { %668 = vmatpush.msra.mxu1 %v567_v28  ;;  %1553 = vmatpush.msrb.mxu2 %v567_v28 }
 0x1d0   : > { %669 = vmatpush.msra.mxu1 %v565_v29  ;;  %1554 = vmatpush.msrb.mxu2 %v565_v29  ;;  %v548_v33 = vpop.permute.xlu0 %547 }
 0x1d1   : > { %v559_v34 = vsel %vm258_vm0, %v512_v2, %v548_v33  ;;  %v526_v23 = vpop.f32.mrf.mxu0 }
 0x1d2   : > { %v563_v36 = vmul.f32 %v559_v34, %v2023_v30  ;;  %v564_v42 = vmul.f32 %v559_v34, %v2047_v40  ;;  %v2098_v29 = vadd.f32 %v526_v23, %v433_v26 }
 0x1d4   : > { %670 = vmatpush.msra.mxu1 %v563_v36  ;;  %1555 = vmatpush.msrb.mxu2 %v563_v36 }
 0x1d6   : > { %708 = vmatpush.msra.mxu2 %v570_v37 }
 0x1d8   : > { %709 = vmatpush.msra.mxu2 %v568_v39  ;;  %v438_v28 = vpop.permute.xlu0 %437 }
 0x1d9   : > { %v529_v33 = vpop.f32.mrf.mxu0 }
 0x1da   : > { %710 = vmatpush.msra.mxu2 %v566_v41  ;;  %v2102_v34 = vadd.f32 %v529_v33, %v438_v28 }
 0x1dc   : > { %711 = vmatpush.msra.mxu2 %v564_v42 }
 0x1e0   : > { %v443_v36 = vpop.permute.xlu0 %442 }
 0x1e1   : > { %v2106_v37 = vadd.f32 %v532_v51, %v443_v36 }
 0x227   : > { %v615_v43 = vpop.trf.xlu1 }
 0x228   : > { %1501 = vmatmul.msk.f32.vlgmr.msra.gmra.mxu1 %vm445_vm5, %v615_v43 }
 0x22f   : > { %v616_v44 = vpop.trf.xlu1 }
 0x230   : > { %1502 = vmatmul.msk.f32.gmra.mxu1 %vm445_vm5, %v616_v44 }
 0x237   : > { %v617_v45 = vpop.trf.xlu1 }
 0x238   : > { %1503 = vmatmul.msk.f32.gmra.mxu1 %vm445_vm5, %v617_v45 }
 0x23f   : > { %v618_v46 = vpop.trf.xlu1 }
 0x240   : > { %1504 = vmatmul.msk.f32.gmra.mxu1 %vm445_vm5, %v618_v46 }
 0x247   : > { %v619_v47 = vpop.trf.xlu1 }
 0x248   : > { %1505 = vmatmul.msk.f32.gmra.mxu1 %vm445_vm5, %v619_v47 }
 0x24f   : > { %v620_v48 = vpop.trf.xlu1 }
 0x250   : > { %1506 = vmatmul.msk.f32.gmra.mxu1 %vm445_vm5, %v620_v48 }
 0x257   : > { %v621_v49 = vpop.trf.xlu1 }
 0x258   : > { %1507 = vmatmul.msk.f32.gmra.mxu1 %vm445_vm5, %v621_v49 }
 0x25f   : > { %v622_v50 = vpop.trf.xlu1 }
 0x260   : > { %1508 = vmatmul.msk.f32.vlgmr.msrb.gmra.mxu2 %vm445_vm5, %v622_v50 }
 0x268   : > { %1509 = vmatmul.msk.f32.vlgmr.msra.gmra.mxu2 %vm445_vm5, %v615_v43 }
 0x270   : > { %1510 = vmatmul.msk.f32.gmra.mxu2 %vm445_vm5, %v616_v44 }
 0x278   : > { %1511 = vmatmul.msk.f32.gmra.mxu2 %vm445_vm5, %v617_v45 }
 0x280   : > { %1512 = vmatmul.msk.f32.gmra.mxu2 %vm445_vm5, %v618_v46 }
 0x288   : > { %1513 = vmatmul.msk.f32.gmra.mxu2 %vm445_vm5, %v619_v47 }
 0x290   : > { %1514 = vmatmul.msk.f32.gmra.mxu2 %vm445_vm5, %v620_v48 }
 0x298   : > { %1515 = vmatmul.msk.f32.gmra.mxu2 %vm445_vm5, %v621_v49 }
 0x2a0   : > { %1516 = vmatmul.msk.f32.gmra.mxu2 %vm445_vm5, %v622_v50 }
 0x2a5   : > { %v2067_v52 = vpop.f32.mrf.mxu1 }
 0x2ad   : > { %v2069_v54 = vpop.f32.mrf.mxu1 }
 0x2b5   : > { %v2073_v56 = vpop.f32.mrf.mxu1 }
 0x2bd   : > { %v2081_v60 = vpop.f32.mrf.mxu1 }
 0x2c5   : > { %v684_v63 = vpop.f32.mrf.mxu1 }
 0x2cd   : > { %v687_v6 = vpop.f32.mrf.mxu1 }
 0x2d5   : > { %v690_v12 = vpop.f32.mrf.mxu1 }
 0x2e3   : > { %v693_v53 = vpop.f32.mrf.mxu2 }
 0x2eb   : > { %v2071_v55 = vpop.f32.mrf.mxu2 }
 0x2ec   : > { %v737_v17 = vmax.f32 %v2067_v52, %v2071_v55 }
 0x2f3   : > { %v2075_v57 = vpop.f32.mrf.mxu2 }
 0x2f4   : > { %v740_v20 = vmax.f32 %v2069_v54, %v2075_v57 }
 0x2fb   : > { %v2077_v58 = vpop.f32.mrf.mxu2 }
 0x2fc   : > { %v743_v59 = vmax.f32 %v2073_v56, %v2077_v58 }
 0x2fe   : > { %744 = vmax.xlane.f32.xlu1 %v743_v59 }
 0x303   : > { %v2083_v61 = vpop.f32.mrf.mxu2 }
 0x304   : > { %v746_v62 = vmax.f32 %v2081_v60, %v2083_v61 }
 0x306   : > { %747 = vmax.xlane.f32.xlu2 %v746_v62 }
 0x30b   : > { %v2087_v2 = vpop.f32.mrf.mxu2 }
 0x30c   : > { %v749_v3 = vmax.f32 %v684_v63, %v2087_v2 }
 0x30e   : > { %750 = vmax.xlane.f32.xlu0 %v749_v3 }
 0x313   : > { %v728_v9 = vpop.f32.mrf.mxu2 }
 0x314   : > { %v752_v10 = vmax.f32 %v687_v6, %v728_v9 }
 0x316   : > { %753 = vmax.xlane.f32.xlu0 %v752_v10 }
 0x31b   : > { %v731_v13 = vpop.f32.mrf.mxu2 }
 0x31c   : > { %v755_v14 = vmax.f32 %v690_v12, %v731_v13 }
 0x31e   : > { %756 = vmax.xlane.f32.xlu2 %v755_v14 }
 0x323   : > { %v734_v16 = vpop.f32.mrf.mxu2 }
 0x324   : > { %v758_v18 = vmax.f32 %v693_v53, %v734_v16 }
 0x326   : > { %738 = vmax.xlane.f32.xlu2 %v737_v17  ;;  %759 = vmax.xlane.f32.xlu0 %v758_v18 }
 0x32e   : > { %741 = vmax.xlane.f32.xlu0 %v740_v20 }
 0x33e   : > { %575 = vrot.lane.b32.xlu2 %v2094_v25, %s1758_s17 }
 0x342   : > { %577 = vrot.lane.b32.xlu0 %v2098_v29, %s1758_s17 }
 0x346   : > { %579 = vrot.lane.b32.xlu2 %v2102_v34, %s1758_s17 }
 0x34e   : > { %581 = vrot.lane.b32.xlu2 %v2106_v37, %s1758_s17  ;;  %s1711_s17 = scalar_lea.hbm %s2468_s6, 64 }
 0x34f   : > { %p1713_p1 = scmp.lt.s32.totalorder %s1711_s17, %s1707_s10 }
 0x351   : > { %p1714_p2 = por %p1713_p1, %p1712_p0 }
 0x353   : > { %p1715_p3 = pnand %p1714_p2, %p1710_p13 }
 0x379   : > { %v748_v41 = vpop.xlane.xlu2 %747 }
 0x381   : > { %v751_v39 = vpop.xlane.xlu0 %750 }
 0x382   : > { %v769_v10 = vsub.f32 %v684_v63, %v751_v39  ;;  %v770_v17 = vsub.f32 %v2087_v2, %v751_v39  ;;  %v768_v63 = vsub.f32 %v2083_v61, %v748_v41 }
 0x384   : > { %v791_v23 = vmul.f32 1.442695, %v768_v63 }
 0x389   : > { %v754_v42 = vpop.xlane.xlu0 %753 }
 0x38a   : > { %v771_v59 = vsub.f32 %v687_v6, %v754_v42  ;;  %v772_v3 = vsub.f32 %v728_v9, %v754_v42  ;;  %v793_v6 = vmul.f32 1.442695, %v769_v10  ;;  %v745_v9 = vpop.xlane.xlu1 %744 }
 0x38b   : > { %v765_v21 = vsub.f32 %v2073_v56, %v745_v9 }
 0x38c   : > { %v797_v14 = vmul.f32 1.442695, %v771_v59  ;;  %v799_v18 = vmul.f32 1.442695, %v772_v3 }
 0x38d   : > { %v785_v33 = vmul.f32 1.442695, %v765_v21 }
 0x391   : > { %v757_v43 = vpop.xlane.xlu2 %756 }
 0x392   : > { %v773_v47 = vsub.f32 %v690_v12, %v757_v43  ;;  %v774_v49 = vsub.f32 %v731_v13, %v757_v43  ;;  %v767_v12 = vsub.f32 %v2081_v60, %v748_v41  ;;  %v795_v13 = vmul.f32 1.442695, %v770_v17 }
 0x393   : > { %v766_v60 = vsub.f32 %v2077_v58, %v745_v9 }
 0x394   : > { %v801_v62 = vmul.f32 1.442695, %v773_v47  ;;  %v803_v51 = vmul.f32 1.442695, %v774_v49  ;;  %v789_v22 = vmul.f32 1.442695, %v767_v12 }
 0x395   : > { %v787_v39 = vmul.f32 1.442695, %v766_v60 }
 0x399   : > { %v760_v44 = vpop.xlane.xlu0 %759  ;;  %v739_v56 = vpop.xlane.xlu2 %738 }
 0x39a   : > { %v775_v45 = vsub.f32 %v693_v53, %v760_v44  ;;  %v776_v46 = vsub.f32 %v734_v16, %v760_v44  ;;  %v761_v58 = vsub.f32 %v2067_v52, %v739_v56 }
 0x39c   : > { %v805_v48 = vmul.f32 1.442695, %v775_v45  ;;  %v807_v50 = vmul.f32 1.442695, %v776_v46  ;;  %v762_v45 = vsub.f32 %v2071_v55, %v739_v56 }
 0x39e   : > { %1635 = vpow2.f32 %v805_v48  ;;  %v777_v48 = vmul.f32 1.442695, %v761_v58 }
 0x39f   : > { %1637 = vpow2.f32 %v807_v50 }
 0x3a0   : > { %1639 = vpow2.f32 %v801_v62 }
 0x3a1   : > { %1641 = vpow2.f32 %v803_v51  ;;  %v742_v26 = vpop.xlane.xlu0 %741  ;;  %v576_v59 = vpop.permute.xlu2 %575 }
 0x3a2   : > { %1643 = vpow2.f32 %v797_v14  ;;  %v763_v36 = vsub.f32 %v2069_v54, %v742_v26  ;;  %v764_v41 = vsub.f32 %v2075_v57, %v742_v26  ;;  %v779_v57 = vmul.f32 1.442695, %v762_v45 }
 0x3a3   : > { %1645 = vpow2.f32 %v799_v18  ;;  %v587_v62 = vsel %vm258_vm0, %v2094_v25, %v576_v59  ;;  %v934_v59 = vld [vmem:[%s2465_s3 + $0x8] sm:$0xff] }
 0x3a4   : > { %v1636_v20 = vpop.eup %1635  ;;  %1647 = vpow2.f32 %v793_v6  ;;  %v781_v44 = vmul.f32 1.442695, %v763_v36  ;;  %v783_v46 = vmul.f32 1.442695, %v764_v41  ;;  %v591_v10 = vmul.f32 %v587_v62, %v2023_v30 }
 0x3a5   : > { %v2111_v53 = vpop.eup %1637  ;;  %817 = vmatpush.xpose.msra.mxu3 %v1636_v20  ;;  %875 = vmatpush.xpose.msrb.mxu1 %v1636_v20  ;;  %1649 = vpow2.f32 %v795_v13 }
 0x3a6   : > { %904 = vmatpush.xpose.msrb.mxu2 %v2111_v53  ;;  %v1640_v16 = vpop.eup %1639  ;;  %1651 = vpow2.f32 %v789_v22 }
 0x3a7   : > { %v2116_v2 = vpop.eup %1641  ;;  %1653 = vpow2.f32 %v791_v23 }
 0x3a8   : > { %v1644_v28 = vpop.eup %1643  ;;  %1655 = vpow2.f32 %v785_v33 }
 0x3a9   : > { %818 = vmatpush.xpose.msra.mxu3 %v1640_v16  ;;  %876 = vmatpush.xpose.msrb.mxu1 %v1640_v16  ;;  %v1646_v61 = vpop.eup %1645  ;;  %1657 = vpow2.f32 %v787_v39  ;;  %v580_v17 = vpop.permute.xlu2 %579 }
 0x3aa   : > { %905 = vmatpush.xpose.msrb.mxu2 %v2116_v2  ;;  %v1648_v42 = vpop.eup %1647  ;;  %1659 = vpow2.f32 %v781_v44 }
 0x3ab   : > { %v1650_v43 = vpop.eup %1649  ;;  %1661 = vpow2.f32 %v783_v46 }
 0x3ac   : > { %v1652_v54 = vpop.eup %1651  ;;  %1663 = vpow2.f32 %v777_v48 }
 0x3ad   : > { %819 = vmatpush.xpose.msra.mxu3 %v1644_v28  ;;  %877 = vmatpush.xpose.msrb.mxu1 %v1644_v28  ;;  %v1654_v47 = vpop.eup %1653  ;;  %1665 = vpow2.f32 %v779_v57  ;;  %v1759_v28 = vmov 2   ;;  %v1761_v57 = vmov 3  }
 0x3ae   : > { %906 = vmatpush.xpose.msrb.mxu2 %v1646_v61  ;;  %v1656_v49 = vpop.eup %1655  ;;  %1617 = vset.pattern.permute.xlu0 %v1759_v28 }
 0x3af   : > { %v1658_v50 = vpop.eup %1657  ;;  %1618 = vset.pattern.permute.xlu2 %v1759_v28  ;;  %938 = vperm.xlu0 %1617, %v1868_v4  }
 0x3b0   : > { %v1660_v52 = vpop.eup %1659  ;;  %942 = vperm.xlu2 %1618, %v1873_v5  }
 0x3b1   : > { %820 = vmatpush.xpose.msra.mxu3 %v1648_v42  ;;  %878 = vmatpush.xpose.msrb.mxu1 %v1648_v42  ;;  %v1662_v55 = vpop.eup %1661 }
 0x3b2   : > { %907 = vmatpush.xpose.msrb.mxu2 %v1650_v43  ;;  %v1664_v3 = vpop.eup %1663 }
 0x3b3   : > { %v1666_v51 = vpop.eup %1665 }
 0x3b4   : > { %v578_v14 = vpop.permute.xlu0 %577 }
 0x3b5   : > { %821 = vmatpush.xpose.msra.mxu3 %v1652_v54  ;;  %879 = vmatpush.xpose.msrb.mxu1 %v1652_v54  ;;  %v588_v25 = vsel %vm258_vm0, %v2098_v29, %v578_v14 }
 0x3b6   : > { %908 = vmatpush.xpose.msrb.mxu2 %v1654_v47  ;;  %v593_v18 = vmul.f32 %v588_v25, %v2016_v27 }
 0x3b7   : > { %950 = vperm.xlu0 %1617, %v1853_v0  }
 0x3b8   : > { %946 = vperm.xlu2 %1618, %v1858_v1  }
 0x3b9   : > { %822 = vmatpush.xpose.msra.mxu3 %v1656_v49  ;;  %880 = vmatpush.xpose.msrb.mxu1 %v1656_v49 }
 0x3ba   : > { %909 = vmatpush.xpose.msrb.mxu2 %v1658_v50 }
 0x3bd   : > { %823 = vmatpush.xpose.msra.mxu3 %v1660_v52  ;;  %881 = vmatpush.xpose.msrb.mxu1 %v1660_v52  ;;  %v933_v52 = vld [vmem:[%s2465_s3] sm:$0xff] }
 0x3be   : > { %910 = vmatpush.xpose.msrb.mxu2 %v1662_v55 }
 0x3bf   : > { %1620 = vset.pattern.permute.xlu0 %v1761_v57 }
 0x3c0   : > { %1619 = vset.pattern.permute.xlu2 %v1761_v57  ;;  %1058 = vperm.xlu0 %1620, %v1858_v1  }
 0x3c1   : > { %824 = vmatpush.xpose.msra.mxu3 %v1664_v3  ;;  %882 = vmatpush.xpose.msrb.mxu1 %v1664_v3 }
 0x3c2   : > { %911 = vmatpush.xpose.msrb.mxu2 %v1666_v51  ;;  %1062 = vperm.xlu2 %1619, %v1853_v0  }
 0x3c4   : > { %825 = vmatmul.f32.vlgmr.msra.gmra.mxu3 %v591_v10  ;;  %883 = vmatmul.f32.vlgmr.msrb.gmra.mxu1 %v2023_v30  ;;  %v589_v30 = vsel %vm258_vm0, %v2102_v34, %v580_v17  ;;  %v592_v34 = vmul.f32 %v587_v62, %v2047_v40 }
 0x3c5   : > { %846 = vmatpush.xpose.msrb.mxu3 %v2111_v53  ;;  %912 = vmatmul.f32.vlgmr.msrb.gmra.mxu2 %v2047_v40  ;;  %v595_v20 = vmul.f32 %v589_v30, %v2009_v24  ;;  %v582_v53 = vpop.permute.xlu2 %581  ;;  %v596_v12 = vmul.f32 %v589_v30, %v2034_v35 }
 0x3c6   : > { %v590_v29 = vsel %vm258_vm0, %v2106_v37, %v582_v53 }
 0x3c7   : > { %v598_v37 = vmul.f32 %v590_v29, %v2028_v31 }
 0x3c9   : > { %847 = vmatpush.xpose.msrb.mxu3 %v2116_v2 }
 0x3cc   : > { %828 = vmatmul.f32.gmra.mxu3 %v593_v18  ;;  %886 = vmatmul.f32.gmra.mxu1 %v2016_v27  ;;  %v597_v27 = vmul.f32 %v590_v29, %v2002_v19 }
 0x3cd   : > { %848 = vmatpush.xpose.msrb.mxu3 %v1646_v61  ;;  %915 = vmatmul.f32.gmra.mxu2 %v2041_v38 }
 0x3d1   : > { %849 = vmatpush.xpose.msrb.mxu3 %v1650_v43 }
 0x3d4   : > { %831 = vmatmul.f32.gmra.mxu3 %v595_v20  ;;  %889 = vmatmul.f32.gmra.mxu1 %v2009_v24  ;;  %v594_v24 = vmul.f32 %v588_v25, %v2041_v38 }
 0x3d5   : > { %850 = vmatpush.xpose.msrb.mxu3 %v1654_v47  ;;  %918 = vmatmul.f32.gmra.mxu2 %v2034_v35  ;;  %v1760_v47 = vmov 4  }
 0x3d6   : > { %1624 = vset.pattern.permute.xlu1 %v1760_v47  ;;  %1621 = vset.pattern.permute.xlu2 %v1760_v47 }
 0x3d7   : > { %1074 = vperm.xlu1 %1624, %v1873_v5   ;;  %1082 = vperm.xlu2 %1621, %v1853_v0   ;;  %v936_v0 = vld [vmem:[%s2465_s3 + $0x18] sm:$0xff] }
 0x3d8   : > { %1623 = vset.pattern.permute.xlu0 %v1760_v47 }
 0x3d9   : > { %851 = vmatpush.xpose.msrb.mxu3 %v1658_v50  ;;  %1078 = vperm.xlu0 %1623, %v1858_v1  }
 0x3dc   : > { %834 = vmatmul.f32.gmra.mxu3 %v597_v27  ;;  %892 = vmatmul.f32.gmra.mxu1 %v2002_v19 }
 0x3dd   : > { %852 = vmatpush.xpose.msrb.mxu3 %v1662_v55  ;;  %921 = vmatmul.f32.gmra.mxu2 %v2028_v31  ;;  %v935_v55 = vld [vmem:[%s2465_s3 + $0x10] sm:$0xff] }
 0x3df   : > { %1622 = vset.pattern.permute.xlu2 %v1761_v57  ;;  %v2212_v57 = vld [vmem:[%s2466_s4 + $0x18] sm:$0xff] }
 0x3e0   : > { %1054 = vperm.xlu2 %1622, %v1873_v5  }
 0x3e1   : > { %853 = vmatpush.xpose.msrb.mxu3 %v1666_v51 }
 0x3e4   : > { %854 = vmatmul.f32.vlgmr.msrb.gmra.mxu3 %v592_v34 }
 0x3e8   : > { %1050 = vperm.xlu2 %1622, %v1868_v4  }
 0x3ec   : > { %857 = vmatmul.f32.gmra.mxu3 %v594_v24 }
 0x3f0   : > { %1625 = vset.pattern.permute.xlu2 %v1760_v47 }
 0x3f1   : > { %1070 = vperm.xlu2 %1625, %v1868_v4  }
 0x3f4   : > { %860 = vmatmul.f32.gmra.mxu3 %v596_v12 }
 0x3fc   : > { %863 = vmatmul.f32.gmra.mxu3 %v598_v37 }
 0x40a   : > { %v943_v62 = vpop.permute.xlu2 %942 }
 0x412   : > { %v947_v14 = vpop.permute.xlu2 %946 }
 0x421   : > { %v939_v51 = vpop.permute.xlu0 %938 }
 0x429   : > { %v951_v53 = vpop.permute.xlu0 %950 }
 0x441   : > { %v884_v63 = vpop.f32.mrf.mxu1 }
 0x447   : > { %v826_v6 = vpop.f32.mrf.mxu3 }
 0x448   : > { %v913_v13 = vpop.f32.mrf.mxu2 }
 0x449   : > { %v887_v16 = vpop.f32.mrf.mxu1  ;;  %v914_v36 = vadd.f32 %v913_v13, %v884_v63 }
 0x44f   : > { %v829_v9 = vpop.f32.mrf.mxu3 }
 0x450   : > { %v916_v2 = vpop.f32.mrf.mxu2 }
 0x451   : > { %v890_v40 = vpop.f32.mrf.mxu1  ;;  %v917_v33 = vadd.f32 %v916_v2, %v887_v16 }
 0x457   : > { %v832_v19 = vpop.f32.mrf.mxu3 }
 0x458   : > { %v919_v60 = vpop.f32.mrf.mxu2 }
 0x459   : > { %v893_v38 = vpop.f32.mrf.mxu1  ;;  %v920_v31 = vadd.f32 %v919_v60, %v890_v40 }
 0x45f   : > { %v835_v21 = vpop.f32.mrf.mxu3 }
 0x460   : > { %v922_v26 = vpop.f32.mrf.mxu2 }
 0x461   : > { %v923_v35 = vadd.f32 %v922_v26, %v893_v38 }
 0x463   : > { %1667 = vrcp.f32 %v923_v35 }
 0x464   : > { %1669 = vrcp.f32 %v920_v31 }
 0x465   : > { %1671 = vrcp.f32 %v917_v33 }
 0x466   : > { %1673 = vrcp.f32 %v914_v36 }
 0x467   : > { %v855_v22 = vpop.f32.mrf.mxu3 }
 0x468   : > { %v856_v46 = vadd.f32 %v855_v22, %v826_v6 }
 0x469   : > { %v1668_v39 = vpop.eup %1667 }
 0x46a   : > { %v1670_v43 = vpop.eup %1669 }
 0x46b   : > { %v1672_v45 = vpop.eup %1671 }
 0x46c   : > { %v1674_v48 = vpop.eup %1673 }
 0x46d   : > { %v929_v50 = vmul.f32 %v1674_v48, %v856_v46  ;;  %v1762_v48 = vmov 5  }
 0x46e   : > { %1626 = vset.pattern.permute.xlu0 %v1762_v48  ;;  %1627 = vset.pattern.permute.xlu2 %v1762_v48 }
 0x46f   : > { %v858_v23 = vpop.f32.mrf.mxu3  ;;  %1107 = vperm.xlu0 %1626, %v2212_v57  }
 0x470   : > { %v859_v58 = vadd.f32 %v858_v23, %v829_v9 }
 0x472   : > { %v930_v49 = vmul.f32 %v1672_v45, %v859_v58 }
 0x477   : > { %v861_v61 = vpop.f32.mrf.mxu3 }
 0x478   : > { %v862_v41 = vadd.f32 %v861_v61, %v832_v19 }
 0x47a   : > { %v931_v54 = vmul.f32 %v1670_v43, %v862_v41 }
 0x47f   : > { %v864_v56 = vpop.f32.mrf.mxu3 }
 0x480   : > { %v865_v42 = vadd.f32 %v864_v56, %v835_v21 }
 0x482   : > { %v932_v44 = vmul.f32 %v1668_v39, %v865_v42  ;;  %v1063_v42 = vpop.permute.xlu2 %1062 }
 0x484   : > { %977 = vmatpush.msra.mxu3 %v932_v44 }
 0x486   : > { %978 = vmatpush.msra.mxu3 %v931_v54 }
 0x488   : > { %979 = vmatpush.msra.mxu3 %v930_v49  ;;  %v2218_v49 = vld [vmem:[%s2466_s4 + $0x10] sm:$0xff] }
 0x489   : > { %1103 = vperm.xlu2 %1627, %v2218_v49  }
 0x48a   : > { %980 = vmatpush.msra.mxu3 %v929_v50  ;;  %v1083_v54 = vpop.permute.xlu2 %1082 }
 0x48b   : > { %1517 = vmatmul.msk.f32.vlgmr.msra.gmra.mxu3 %vm445_vm5, %v933_v52 }
 0x492   : > { %v1055_v52 = vpop.permute.xlu2 %1054 }
 0x493   : > { %1518 = vmatmul.msk.f32.gmra.mxu3 %vm445_vm5, %v934_v59 }
 0x49b   : > { %1519 = vmatmul.msk.f32.gmra.mxu3 %vm445_vm5, %v935_v55 }
 0x4a3   : > { %1520 = vmatmul.msk.f32.gmra.mxu3 %vm445_vm5, %v936_v0  ;;  %v1059_v0 = vpop.permute.xlu0 %1058 }
 0x50e   : > { %v982_v1 = vpop.f32.mrf.mxu3 }
 0x50f   : > { %v983_v25 = vadd.f32 %v982_v1, %v939_v51  ;;  %v2224_v1 = vld [vmem:[%s2466_s4] sm:$0xff] }
 0x510   : > { %1095 = vperm.xlu0 %1626, %v2224_v1  }
 0x511   : > { %v2183_v30 = vadd.f32 %v983_v25, %v1884_v7 }
 0x513   : > { %v998_v27 = vsel %vm258_vm0, %v2183_v30, 0.0 }
 0x516   : > { %v985_v3 = vpop.f32.mrf.mxu3 }
 0x517   : > { %v986_v10 = vadd.f32 %v985_v3, %v943_v62  ;;  %v2230_v62 = vld [vmem:[%s2466_s4 + $0x8] sm:$0xff] }
 0x518   : > { %1099 = vperm.xlu2 %1627, %v2230_v62  }
 0x519   : > { %v2180_v18 = vadd.f32 %v986_v10, %v1886_v8 }
 0x51b   : > { %v999_v4 = vsel %vm258_vm0, %v2180_v18, 0.0 }
 0x51c   : > { %v1000_v8 = vadd.f32 %v999_v4, %v998_v27  ;;  %v1079_v27 = vpop.permute.xlu0 %1078 }
 0x51e   : > { %v988_v5 = vpop.f32.mrf.mxu3 }
 0x51f   : > { %v989_v17 = vadd.f32 %v988_v5, %v947_v14  ;;  %v1051_v14 = vpop.permute.xlu2 %1050 }
 0x521   : > { %v2186_v20 = vadd.f32 %v989_v17, %v1893_v11 }
 0x523   : > { %v1001_v34 = vsel %vm258_vm0, %v2186_v20, 0.0 }
 0x524   : > { %v1002_v7 = vadd.f32 %v1001_v34, %v1000_v8  ;;  %v1075_v8 = vpop.permute.xlu1 %1074 }
 0x526   : > { %v991_v29 = vpop.f32.mrf.mxu3 }
 0x527   : > { %v992_v24 = vadd.f32 %v991_v29, %v951_v53 }
 0x529   : > { %v2195_v12 = vadd.f32 %v992_v24, %v1898_v15 }
 0x52b   : > { %v1003_v11 = vsel %vm258_vm0, %v2195_v12, 0.0 }
 0x52c   : > { %v1004_v37 = vadd.f32 %v1003_v11, %v1002_v7 }
 0x52e   : > { %v1005_v6 = vrot.slane %v1004_v37, 4 }
 0x530   : > { %v1006_v9 = vadd.f32 %v1005_v6, %v1004_v37  ;;  %v1071_v37 = vpop.permute.xlu2 %1070 }
 0x532   : > { %v1007_v63 = vrot.slane %v1006_v9, 2 }
 0x534   : > { %v1008_v13 = vadd.f32 %v1007_v63, %v1006_v9  ;;  %v1521_v63 = vld [vmem:[%s2465_s3 + $0x20] sm:$0xff] }
 0x536   : > { %v1009_v19 = vrot.slane %v1008_v13, 1 }
 0x538   : > { %v1010_v16 = vadd.f32 %v1009_v19, %v1008_v13  ;;  %v1522_v13 = vld [vmem:[%s2465_s3 + $0x28] sm:$0xff]  ;;  %v1523_v19 = vld [vmem:[%s2465_s3 + $0x30] sm:$0xff] }
 0x53a   : > { %v1011_v2 = vmul.f32 %v1010_v16, %v1908_v32  ;;  %v1524_v16 = vld [vmem:[%s2465_s3 + $0x38] sm:$0xff] }
 0x53c   : > { %v1012_v21 = vsub.f32 %v2183_v30, %v1011_v2  ;;  %v1013_v22 = vsub.f32 %v2180_v18, %v1011_v2  ;;  %v1014_v15 = vsub.f32 %v2186_v20, %v1011_v2  ;;  %v1015_v40 = vsub.f32 %v2195_v12, %v1011_v2 }
 0x53d   : > { %v1763_v2 = vmov 1.4142135  }
 0x53e   : > { %v1016_v60 = vmul.f32 %v1012_v21, %v1012_v21  ;;  %v1017_v23 = vmul.f32 %v1013_v22, %v1013_v22  ;;  %v1018_v38 = vmul.f32 %v1014_v15, %v1014_v15  ;;  %v1019_v26 = vmul.f32 %v1015_v40, %v1015_v40 }
 0x540   : > { %v1020_v28 = vsel %vm258_vm0, %v1016_v60, 0.0  ;;  %v1021_v35 = vsel %vm258_vm0, %v1017_v23, 0.0  ;;  %v1023_v61 = vsel %vm258_vm0, %v1018_v38, 0.0  ;;  %v1025_v36 = vsel %vm258_vm0, %v1019_v26, 0.0  ;;  %v1104_v23 = vpop.permute.xlu2 %1103 }
 0x541   : > { %v1022_v31 = vadd.f32 %v1021_v35, %v1020_v28 }
 0x543   : > { %v1024_v33 = vadd.f32 %v1023_v61, %v1022_v31 }
 0x545   : > { %v1026_v39 = vadd.f32 %v1025_v36, %v1024_v33 }
 0x547   : > { %v1027_v56 = vrot.slane %v1026_v39, 4 }
 0x549   : > { %v1028_v41 = vadd.f32 %v1027_v56, %v1026_v39 }
 0x54b   : > { %v1029_v43 = vrot.slane %v1028_v41, 2 }
 0x54d   : > { %v1030_v58 = vadd.f32 %v1029_v43, %v1028_v41 }
 0x54f   : > { %v1031_v44 = vrot.slane %v1030_v58, 1 }
 0x551   : > { %v1032_v45 = vadd.f32 %v1031_v44, %v1030_v58 }
 0x553   : > { %v1033_v46 = vmul.f32 %v1032_v45, %v1908_v32 }
 0x555   : > { %v1034_v47 = vadd.f32 1e-05, %v1033_v46 }
 0x557   : > { %1675 = vrsqrt.f32 %v1034_v47  ;;  %vm1041_vm7 = vweird.f32 %v1034_v47 }
 0x558   : > { %1677 = vrcp.f32 %v1763_v2 }
 0x55d   : > { %v1676_v32 = vpop.eup %1675 }
 0x55e   : > { %v1036_v50 = vmul.f32 %v1676_v32, %v1034_v47  ;;  %vm1042_vm6 = vweird.f32 %v1676_v32 }
 0x55f   : > { %vm1043_vm8 = vmor %vm1041_vm7, %vm1042_vm6 }
 0x560   : > { %v1037_v59 = vmul.f32 %v1676_v32, %v1036_v50 }
 0x562   : > { %v1038_v55 = vmul.f32 0.5, %v1037_v59 }
 0x564   : > { %v1039_v3 = vsub.f32 1.5, %v1038_v55 }
 0x566   : > { %v1040_v51 = vmul.f32 %v1676_v32, %v1039_v3 }
 0x568   : > { %v1044_v10 = vsel %vm1043_vm8, %v1676_v32, %v1040_v51 }
 0x569   : > { %v1048_v5 = vmul.f32 %v1044_v10, %v1015_v40  ;;  %v1046_v25 = vmul.f32 %v1044_v10, %v1013_v22  ;;  %v1047_v17 = vmul.f32 %v1044_v10, %v1014_v15  ;;  %v1045_v53 = vmul.f32 %v1044_v10, %v1012_v21  ;;  %v1678_v21 = vpop.eup %1677  ;;  %v1108_v15 = vpop.permute.xlu0 %1107 }
 0x56a   : > { %v1156_v22 = vmul.f32 1.4142135, %v1678_v21  ;;  %vm1160_vm9 = vweird.f32 %v1678_v21 }
 0x56b   : > { %v1068_v4 = vmul.f32 %v1063_v42, %v1048_v5  ;;  %v1067_v29 = vmul.f32 %v1059_v0, %v1047_v17  ;;  %v1066_v24 = vmul.f32 %v1055_v52, %v1046_v25  ;;  %v1065_v7 = vmul.f32 %v1051_v14, %v1045_v53 }
 0x56c   : > { %v1157_v40 = vsub.f32 1.0, %v1156_v22 }
 0x56d   : > { %v1088_v34 = vadd.f32 %v1083_v54, %v1068_v4  ;;  %v1087_v11 = vadd.f32 %v1079_v27, %v1067_v29  ;;  %v1086_v6 = vadd.f32 %v1075_v8, %v1066_v24  ;;  %v1085_v9 = vadd.f32 %v1071_v37, %v1065_v7 }
 0x56e   : > { %v1158_v60 = vmul.f32 %v1678_v21, %v1157_v40 }
 0x56f   : > { %1134 = vmatpush.msrb.mxu0 %v1088_v34 }
 0x570   : > { %v1159_v38 = vadd.f32 %v1678_v21, %v1158_v60 }
 0x571   : > { %1135 = vmatpush.msrb.mxu0 %v1087_v11 }
 0x572   : > { %v1161_v35 = vsel %vm1160_vm9, %v1678_v21, %v1159_v38  ;;  %v1100_v36 = vpop.permute.xlu2 %1099 }
 0x573   : > { %1136 = vmatpush.msrb.mxu0 %v1086_v6 }
 0x575   : > { %1137 = vmatpush.msrb.mxu0 %v1085_v9 }
 0x576   : > { %1525 = vmatmul.msk.f32.vlgmr.msrb.gmra.mxu0 %vm445_vm5, %v1521_v63 }
 0x57e   : > { %1526 = vmatmul.msk.f32.gmra.mxu0 %vm445_vm5, %v1522_v13 }
 0x582   : > { %v1096_v26 = vpop.permute.xlu0 %1095 }
 0x586   : > { %1527 = vmatmul.msk.f32.gmra.mxu0 %vm445_vm5, %v1523_v19 }
 0x58e   : > { %1528 = vmatmul.msk.f32.gmra.mxu0 %vm445_vm5, %v1524_v16 }
 0x5f3   : > { %v1139_v28 = vpop.f32.mrf.mxu0 }
 0x5f4   : > { %v2249_v31 = vadd.f32 %v1139_v28, %v1096_v26 }
 0x5f6   : > { %v2252_v61 = vmul.f32 %v1161_v35, %v2249_v31 }
 0x5f8   : > { %v1166_v33 = vmul.f32 %v2252_v61, %v2252_v61 }
 0x5fa   : > { %v2256_v39 = vmin.f32 %v1166_v33, 16.0 }
 0x5fb   : > { %v1142_v56 = vpop.f32.mrf.mxu0 }
 0x5fc   : > { %v1179_v41 = vmul.f32 3.8918573e-05, %v2256_v39  ;;  %v2259_v42 = vadd.f32 %v1142_v56, %v1100_v36  ;;  %v1168_v3 = vmul.f32 2.1237322e-06, %v2256_v39 }
 0x5fe   : > { %v1180_v43 = vadd.f32 0.001143296, %v1179_v41  ;;  %v2262_v58 = vmul.f32 %v1161_v35, %v2259_v42  ;;  %v1169_v53 = vadd.f32 0.00028619796, %v1168_v3 }
 0x600   : > { %v1181_v44 = vmul.f32 %v1180_v43, %v2256_v39  ;;  %v1206_v45 = vmul.f32 %v2262_v58, %v2262_v58  ;;  %v1170_v63 = vmul.f32 %v1169_v53, %v2256_v39 }
 0x602   : > { %v1182_v46 = vadd.f32 0.014752088, %v1181_v44  ;;  %v2267_v54 = vmin.f32 %v1206_v45, 16.0  ;;  %v1171_v38 = vadd.f32 0.0036580483, %v1170_v63 }
 0x603   : > { %v1145_v47 = vpop.f32.mrf.mxu0 }
 0x604   : > { %v2269_v48 = vadd.f32 %v1145_v47, %v1104_v23  ;;  %v1219_v32 = vmul.f32 3.8918573e-05, %v2267_v54  ;;  %v1183_v50 = vmul.f32 %v1182_v46, %v2256_v39  ;;  %v1208_v11 = vmul.f32 2.1237322e-06, %v2267_v54 }
 0x605   : > { %v1172_v44 = vmul.f32 %v1171_v38, %v2256_v39 }
 0x606   : > { %v2274_v52 = vmul.f32 %v1161_v35, %v2269_v48  ;;  %v1220_v59 = vadd.f32 0.001143296, %v1219_v32  ;;  %v1184_v51 = vadd.f32 0.112945676, %v1183_v50  ;;  %v1209_v22 = vadd.f32 0.00028619796, %v1208_v11 }
 0x608   : > { %v1246_v55 = vmul.f32 %v2274_v52, %v2274_v52  ;;  %v1221_v0 = vmul.f32 %v1220_v59, %v2267_v54  ;;  %v1185_v29 = vmul.f32 %v1184_v51, %v2256_v39  ;;  %v1210_v36 = vmul.f32 %v1209_v22, %v2267_v54 }
 0x60a   : > { %v2280_v10 = vmin.f32 %v1246_v55, 16.0  ;;  %v1222_v14 = vadd.f32 0.014752088, %v1221_v0  ;;  %v1186_v37 = vadd.f32 0.4994258, %v1185_v29 }
 0x60b   : > { %v1148_v5 = vpop.f32.mrf.mxu0  ;;  %v1211_v59 = vadd.f32 0.0036580483, %v1210_v36  ;;  %v1173_v0 = vadd.f32 0.05243302, %v1172_v44 }
 0x60c   : > { %v1259_v25 = vmul.f32 3.8918573e-05, %v2280_v10  ;;  %v1223_v17 = vmul.f32 %v1222_v14, %v2267_v54  ;;  %v2284_v4 = vadd.f32 %v1148_v5, %v1108_v15  ;;  %v1248_v27 = vmul.f32 2.1237322e-06, %v2280_v10 }
 0x60d   : > { %v1187_v15 = vmul.f32 %v1186_v37, %v2256_v39  ;;  %v1174_v53 = vmul.f32 %v1173_v0, %v2256_v39 }
 0x60e   : > { %v1260_v34 = vadd.f32 0.001143296, %v1259_v25  ;;  %v1224_v24 = vadd.f32 0.112945676, %v1223_v17  ;;  %v2289_v8 = vmul.f32 %v1161_v35, %v2284_v4  ;;  %v1249_v13 = vadd.f32 0.00028619796, %v1248_v27 }
 0x60f   : > { %v2309_v43 = vadd.f32 1.0, %v1187_v15  ;;  %v1212_v25 = vmul.f32 %v1211_v59, %v2267_v54 }
 0x610   : > { %v1261_v7 = vmul.f32 %v1260_v34, %v2280_v10  ;;  %v1225_v6 = vmul.f32 %v1224_v24, %v2267_v54  ;;  %v1286_v9 = vmul.f32 %v2289_v8, %v2289_v8  ;;  %v1250_v26 = vmul.f32 %v1249_v13, %v2280_v10 }
 0x611   : > { %vm1194_vm10 = vweird.f32 %v2309_v43 }
 0x612   : > { %v1262_v19 = vadd.f32 0.014752088, %v1261_v7  ;;  %v1226_v16 = vadd.f32 0.4994258, %v1225_v6  ;;  %v2297_v2 = vmin.f32 %v1286_v9, 16.0 }
 0x613   : > { %v1251_v45 = vadd.f32 0.0036580483, %v1250_v26  ;;  %v1213_v7 = vadd.f32 0.05243302, %v1212_v25  ;;  %v1175_v9 = vadd.f32 0.18741608, %v1174_v53 }
 0x614   : > { %v1263_v21 = vmul.f32 %v1262_v19, %v2280_v10  ;;  %v1227_v40 = vmul.f32 %v1226_v16, %v2267_v54  ;;  %v1288_v60 = vmul.f32 2.1237322e-06, %v2297_v2  ;;  %v1299_v23 = vmul.f32 3.8918573e-05, %v2297_v2 }
 0x615   : > { %v1252_v3 = vmul.f32 %v1251_v45, %v2280_v10  ;;  %v1214_v22 = vmul.f32 %v1213_v7, %v2267_v54  ;;  %v1200_v25 = vand.u32 2147483648, %v2309_v43 }
 0x616   : > { %v1264_v28 = vadd.f32 0.112945676, %v1263_v21  ;;  %v1289_v35 = vadd.f32 0.00028619796, %v1288_v60  ;;  %v2307_v56 = vadd.f32 1.0, %v1227_v40 }
 0x617   : > { %v1300_v41 = vadd.f32 0.001143296, %v1299_v23  ;;  %v1253_v29 = vadd.f32 0.05243302, %v1252_v3  ;;  %v1176_v23 = vmul.f32 %v1175_v9, %v2256_v39  ;;  %v1215_v36 = vadd.f32 0.18741608, %v1214_v22 }
 0x618   : > { %v1265_v33 = vmul.f32 %v1264_v28, %v2280_v10  ;;  %v1290_v47 = vmul.f32 %v1289_v35, %v2297_v2  ;;  %1679 = vrcp.f32 %v2307_v56  ;;  %v1198_v39 = vand.u32 2147483647, %v2309_v43 }
 0x619   : > { %v1301_v32 = vmul.f32 %v1300_v41, %v2297_v2  ;;  %1681 = vrcp.f32 %v2309_v43  ;;  %v1254_v13 = vmul.f32 %v1253_v29, %v2280_v10  ;;  %v1177_v44 = vadd.f32 1.1283791, %v1176_v23 }
 0x61a   : > { %v1266_v46 = vadd.f32 0.4994258, %v1265_v33  ;;  %v1291_v14 = vadd.f32 0.0036580483, %v1290_v47  ;;  %v1216_v59 = vmul.f32 %v1215_v36, %v2267_v54  ;;  %v1240_v0 = vand.u32 2147483648, %v2307_v56 }
 0x61b   : > { %v1302_v55 = vadd.f32 0.014752088, %v1301_v32  ;;  %v1255_v26 = vadd.f32 0.18741608, %v1254_v13  ;;  %vm1234_vm1 = vweird.f32 %v2307_v56  ;;  %vm1199_vm8 = vcmp.eq.f32.partialorder %v1198_v39, 8.507059e+37 }
 0x61c   : > { %v1267_v50 = vmul.f32 %v1266_v46, %v2280_v10  ;;  %v1292_v24 = vmul.f32 %v1291_v14, %v2297_v2  ;;  %v1217_v7 = vadd.f32 1.1283791, %v1216_v59  ;;  %v1153_v39 = vmul.f32 0.5, %v2269_v48  ;;  %v1536_v48 = vld [vmem:[%s2465_s3 + $0x58] sm:$0xff] }
 0x61d   : > { %v1303_v5 = vmul.f32 %v1302_v55, %v2297_v2  ;;  %v1256_v46 = vmul.f32 %v1255_v26, %v2280_v10  ;;  %v1238_v55 = vand.u32 2147483647, %v2307_v56 }
 0x61e   : > { %v2318_v51 = vadd.f32 1.0, %v1267_v50  ;;  %v2323_v17 = vpop.eup %1679  ;;  %v1293_v21 = vadd.f32 0.05243302, %v1292_v24 }
 0x61f   : > { %v1304_v27 = vadd.f32 0.112945676, %v1303_v5  ;;  %v2326_v34 = vpop.eup %1681  ;;  %v1230_v37 = vmul.f32 %v2323_v17, %v2307_v56  ;;  %vm1235_vm13 = vweird.f32 %v2323_v17  ;;  %v1257_v54 = vadd.f32 1.1283791, %v1256_v46 }
 0x620   : > { %1683 = vrcp.f32 %v2318_v51  ;;  %v1190_v63 = vmul.f32 %v2326_v34, %v2309_v43  ;;  %v1294_v33 = vmul.f32 %v1293_v21, %v2297_v2  ;;  %v1280_v50 = vand.u32 2147483648, %v2318_v51  ;;  %vm2369_vm2 = vmor %vm1234_vm1, %vm1235_vm13 }
 0x621   : > { %v1305_v11 = vmul.f32 %v1304_v27, %v2297_v2  ;;  %v1231_v60 = vsub.f32 1.0, %v1230_v37  ;;  %vm1274_vm12 = vweird.f32 %v2318_v51  ;;  %v1278_v3 = vand.u32 2147483647, %v2318_v51 }
 0x622   : > { %v1191_v38 = vsub.f32 1.0, %v1190_v63  ;;  %v1295_v32 = vadd.f32 0.18741608, %v1294_v33  ;;  %vm1195_vm14 = vweird.f32 %v2326_v34  ;;  %v1281_v24 = vor.u32 1.1754944e-38, %v1280_v50 }
 0x623   : > { %v1306_v19 = vadd.f32 0.4994258, %v1305_v11  ;;  %v1232_v41 = vmul.f32 %v2323_v17, %v1231_v60  ;;  %vm2373_vm3 = vcmp.eq.f32.partialorder %v1238_v55, 8.507059e+37  ;;  %vm2379_vm4 = vmor %vm1194_vm10, %vm1195_vm14  ;;  %vm1279_vm6 = vcmp.eq.f32.partialorder %v1278_v3, 8.507059e+37 }
 0x624   : > { %v1192_v45 = vmul.f32 %v2326_v34, %v1191_v38  ;;  %v1296_v29 = vmul.f32 %v1295_v32, %v2297_v2  ;;  %v1241_v56 = vor.u32 1.1754944e-38, %v1240_v0  ;;  %v1764_v63 = vmov 6  }
 0x625   : > { %v1307_v15 = vmul.f32 %v1306_v19, %v2297_v2  ;;  %v1233_v14 = vadd.f32 %v2323_v17, %v1232_v41  ;;  %1628 = vset.pattern.permute.xlu1 %v1764_v63  ;;  %1630 = vset.pattern.permute.xlu0 %v1764_v63  ;;  %v1258_v43 = vmul.f32 %v1257_v54, %v2274_v52  ;;  %v1151_v55 = vmul.f32 0.5, %v2249_v31  ;;  %v1535_v31 = vld [vmem:[%s2465_s3 + $0x50] sm:$0xff] }
 0x626   : > { %v1684_v6 = vpop.eup %1683  ;;  %v1193_v5 = vadd.f32 %v2326_v34, %v1192_v45  ;;  %1340 = vperm.xlu1 %1628, %v2224_v1   ;;  %1348 = vperm.xlu0 %1630, %v2218_v49   ;;  %v1297_v21 = vadd.f32 1.1283791, %v1296_v29  ;;  %v1178_v49 = vmul.f32 %v1177_v44, %v2252_v61 }
 0x627   : > { %v1270_v16 = vmul.f32 %v1684_v6, %v2318_v51  ;;  %v2339_v28 = vadd.f32 1.0, %v1307_v15  ;;  %vm1275_vm11 = vweird.f32 %v1684_v6  ;;  %v1237_v2 = vsel %vm2369_vm2, %v2323_v17, %v1233_v14  ;;  %1629 = vset.pattern.permute.xlu2 %v1764_v63 }
 0x628   : > { %vm2360_vm15 = vmor %vm1274_vm12, %vm1275_vm11  ;;  %v1197_v13 = vsel %vm2379_vm4, %v2326_v34, %v1193_v5  ;;  %v1201_v15 = vor.u32 1.1754944e-38, %v1200_v25  ;;  %v1242_v34 = vsel %vm2373_vm3, %v1241_v56, %v1237_v2  ;;  %1344 = vperm.xlu2 %1629, %v2230_v62   ;;  %v1298_v26 = vmul.f32 %v1297_v21, %v2289_v8 }
 0x629   : > { %v1271_v40 = vsub.f32 1.0, %v1270_v16  ;;  %1685 = vrcp.f32 %v2339_v28  ;;  %v1320_v16 = vand.u32 2147483648, %v2339_v28  ;;  %v1318_v22 = vand.u32 2147483647, %v2339_v28 }
 0x62a   : > { %vm1314_vm9 = vweird.f32 %v2339_v28  ;;  %v1202_v1 = vsel %vm1199_vm8, %v1201_v15, %v1197_v13  ;;  %v1152_v8 = vmul.f32 0.5, %v2259_v42  ;;  %v1534_v42 = vld [vmem:[%s2465_s3 + $0x48] sm:$0xff] }
 0x62b   : > { %v1272_v35 = vmul.f32 %v1684_v6, %v1271_v40  ;;  %v1218_v40 = vmul.f32 %v1217_v7, %v2262_v58  ;;  %v1321_v23 = vor.u32 1.1754944e-38, %v1320_v16  ;;  %vm1319_vm11 = vcmp.eq.f32.partialorder %v1318_v22, 8.507059e+37 }
 0x62c   : > { %v1203_v36 = vmul.f32 %v1202_v1, %v1178_v49 }
 0x62d   : > { %v1273_v47 = vadd.f32 %v1684_v6, %v1272_v35  ;;  %v1243_v38 = vmul.f32 %v1242_v34, %v1218_v40 }
 0x62e   : > { %1352 = vperm.xlu1 %1628, %v2212_v57   ;;  %v1529_v44 = vclamps-f32 %v1203_v36, 1.0 }
 0x62f   : > { %v1686_v10 = vpop.eup %1685  ;;  %v1277_v51 = vsel %vm2360_vm15, %v1684_v6, %v1273_v47  ;;  %v1530_v45 = vclamps-f32 %v1243_v38, 1.0 }
 0x630   : > { %v1310_v27 = vmul.f32 %v1686_v10, %v2339_v28  ;;  %v1282_v19 = vsel %vm1279_vm6, %v1281_v24, %v1277_v51  ;;  %vm1315_vm7 = vweird.f32 %v1686_v10  ;;  %v1154_v28 = vmul.f32 0.5, %v2284_v4  ;;  %v1533_v4 = vld [vmem:[%s2465_s3 + $0x40] sm:$0xff] }
 0x631   : > { %v1283_v52 = vmul.f32 %v1282_v19, %v1258_v43  ;;  %vm1316_vm10 = vmor %vm1314_vm9, %vm1315_vm7  ;;  %v1327_v32 = vadd.f32 1.0, %v1530_v45  ;;  %v1326_v59 = vadd.f32 1.0, %v1529_v44 }
 0x632   : > { %v1311_v9 = vsub.f32 1.0, %v1310_v27 }
 0x633   : > { %v1531_v62 = vclamps-f32 %v1283_v52, 1.0  ;;  %v1331_v57 = vmul.f32 %v1327_v32, %v1152_v8  ;;  %v1330_v0 = vmul.f32 %v1326_v59, %v1151_v55 }
 0x634   : > { %v1312_v17 = vmul.f32 %v1686_v10, %v1311_v9 }
 0x635   : > { %v1328_v61 = vadd.f32 1.0, %v1531_v62 }
 0x636   : > { %v1313_v60 = vadd.f32 %v1686_v10, %v1312_v17 }
 0x637   : > { %v1332_v50 = vmul.f32 %v1328_v61, %v1153_v39 }
 0x638   : > { %v1317_v35 = vsel %vm1316_vm10, %v1686_v10, %v1313_v60 }
 0x639   : > { %v1322_v33 = vsel %vm1319_vm11, %v1321_v23, %v1317_v35 }
 0x63a   : > { %v1323_v41 = vmul.f32 %v1322_v33, %v1298_v26 }
 0x63c   : > { %v1532_v58 = vclamps-f32 %v1323_v41, 1.0 }
 0x63e   : > { %v1329_v46 = vadd.f32 1.0, %v1532_v58 }
 0x640   : > { %v1333_v47 = vmul.f32 %v1329_v46, %v1154_v28 }
 0x642   : > { %1379 = vmatpush.msra.mxu1 %v1333_v47 }
 0x644   : > { %1380 = vmatpush.msra.mxu1 %v1332_v50 }
 0x646   : > { %1381 = vmatpush.msra.mxu1 %v1331_v57 }
 0x648   : > { %1382 = vmatpush.msra.mxu1 %v1330_v0 }
 0x649   : > { %1537 = vmatmul.msk.f32.vlgmr.msra.gmra.mxu1 %vm445_vm5, %v1533_v4 }
 0x651   : > { %1538 = vmatmul.msk.f32.gmra.mxu1 %vm445_vm5, %v1534_v42 }
 0x659   : > { %1539 = vmatmul.msk.f32.gmra.mxu1 %vm445_vm5, %v1535_v31 }
 0x661   : > { %1540 = vmatmul.msk.f32.gmra.mxu1 %vm445_vm5, %v1536_v48 }
 0x682   : > { %v1345_v25 = vpop.permute.xlu2 %1344 }
 0x698   : > { %v1341_v3 = vpop.permute.xlu1 %1340  ;;  %v1349_v29 = vpop.permute.xlu0 %1348 }
 0x6c6   : > { %v1384_v14 = vpop.f32.mrf.mxu1 }
 0x6c7   : > { %v1385_v10 = vadd.f32 %v1384_v14, %v1341_v3 }
 0x6c9   : > { %v1396_v5 = vadd.f32 %v1385_v10, %v2183_v30  ;;  %v1353_v30 = vpop.permute.xlu1 %1352 }
 0x6cb   : > { %1400 = vst.msk [vmem:[%s244_s16] sm:$0xff] %vm258_vm0, %v1396_v5 }
 0x6ce   : > { %v1387_v54 = vpop.f32.mrf.mxu1 }
 0x6cf   : > { %v1388_v53 = vadd.f32 %v1387_v54, %v1345_v25 }
 0x6d1   : > { %v1397_v51 = vadd.f32 %v1388_v53, %v2180_v18 }
 0x6d3   : > { %1401 = vst.msk [vmem:[%s244_s16 + $0x8] sm:$0xff] %vm258_vm0, %v1397_v51 }
 0x6d6   : > { %v1390_v27 = vpop.f32.mrf.mxu1 }
 0x6d7   : > { %v1391_v24 = vadd.f32 %v1390_v27, %v1349_v29 }
 0x6d9   : > { %v1398_v7 = vadd.f32 %v1391_v24, %v2186_v20 }
 0x6db   : > { %1402 = vst.msk [vmem:[%s244_s16 + $0x10] sm:$0xff] %vm258_vm0, %v1398_v7 }
 0x6de   : > { %v1393_v11 = vpop.f32.mrf.mxu1 }
 0x6df   : > { %v1394_v18 = vadd.f32 %v1393_v11, %v1353_v30 }
 0x6e1   : > { %v1399_v37 = vadd.f32 %v1394_v18, %v2195_v12 }
 0x6e3   : > { %1403 = vst.msk [vmem:[%s244_s16 + $0x18] sm:$0xff] %vm258_vm0, %v1399_v37 }
 0x6e4   : > { %1718 = shalt.err (!%p1715_p3)
}
 0x6e5   : > { %s1765_s14 = smov 128   ;;  %s1766_s16 = smov 8  }
 0x6e6   : > { %1556 = dma.vmem_to_hbm [thread:$0]  (%p1840_p5), %s1418_s28, 512, %s1420_s29, %s1405_s25, %s1765_s14, %s1765_s14, %s1766_s16  }
 0x6e7 PF: > { %p1562_p4 = scmp.ge.s32.totalorder %s1753_s24, 2  ;;  %s1434_s18 = sand.u32 1, %s1741_s21  }
 0x6e8   : > { %s1435_s19 = scalar_lea.sflag [#allocation3], %s1434_s18 }
 0x6e9   : > { %p1559_p7 = pnand %p1562_p4, %p1844_p6 }
 0x6eb   : > { %p1560_p8 = pneg %p1559_p7 }
 0x6ed   : > { %1736 = dma.done.wait (%p1560_p8), %s1435_s19, 512  }
 0x6ee   : > { %1738 = vsyncadd (%p1560_p8), %s1435_s19, 4294966784  ;;  %p16_p9 = scmp.ge.s32.totalorder %s1827_s27, 4   ;;  %s2479_s21 = smov %s1745_s22 }
 0x6ef   : > { %s2480_s22 = smov %s1749_s23  ;;  %s2481_s23 = smov %s1838_s30 }
 0x6f0   : > { %s2482_s24 = smov %s1827_s27  ;;  %18 = sbr.rel (!%p16_p9) target bundleno = 3 (0x3), region = 81 }
 0x6f5   :  { %1441 = vsyncpa [#allocation3], 1 }
 0x6f6   :  { %1443 = vsyncpa [#allocation3 + $0x1], 1 }

</bundles_post_ra>
